<compile_context>
chip_gen: v7x
topology: tpu7x:2x2x1
jax: 0.10.0
libtpu: 0.0.40
codegen_flags: <defaults>
</compile_context>

<pallas_src>
import jax
import jax.numpy as jnp
from jax.experimental import pallas as pl
from jax.experimental.pallas import tpu as pltpu

C_IN = 512    # fixed by the module: Conv2d(512, 256, 1)
C_MID = 256   # hidden channels
EPS = 1e-5    # BatchNorm2d default eps
TP_MAX = 512  # pixel-tile upper bound (multiple of 128); ~1 MiB f32 input tile


def yolo_head_kernel(x_ref, w1_ref, shift_ref, w2_ref, b2_ref, o_ref):
    # x_ref:     (1, 512, tp)  f32 NCHW slab (pixels on the lane axis)
    # w1_ref:    (256, 512)    bf16, BN scale already folded in
    # shift_ref: (256, 1)      f32 = scale*(b1 - running_mean) + beta
    # w2_ref:    (Cout, 256)   bf16
    # b2_ref:    (Cout, 1)     f32
    # o_ref:     (1, Cout, tp)
    x = x_ref[0].astype(jnp.bfloat16)                                   # VPU cast, hides under DMA/MXU
    h = jnp.dot(w1_ref[...], x, preferred_element_type=jnp.float32)     # conv1 (1x1), f32 acc
    h = h + shift_ref[...]                                              # folded BN(eval) + conv1 bias
    h = jnp.where(h > 0, h, 0.1 * h)                                    # LeakyReLU(0.1)
    o = jnp.dot(w2_ref[...], h.astype(jnp.bfloat16),
                preferred_element_type=jnp.float32)                     # conv2 (1x1)
    o_ref[0] = (o + b2_ref[...]).astype(o_ref.dtype)


def yolo_layer_forward(x_nchw, params):
    """x_nchw: (N, 512, H, W) float32. Returns (N, Cout, H, W)."""
    w1, b1, gamma, beta, running_mean, running_var, w2, b2 = params
    N, C, H, W = x_nchw.shape
    assert C == C_IN
    c_out = w2.shape[0]
    hw = H * W

    # Fold conv1 bias + BatchNorm (eval mode) into conv1 weight / a per-channel shift.
    scale = gamma / jnp.sqrt(running_var + EPS)                          # (256,)
    shift = scale * (b1 - running_mean) + beta                           # (256,)
    w1_bf = (w1.reshape(C_MID, C_IN) * scale[:, None]).astype(jnp.bfloat16)   # (256, 512)
    w2_bf = w2.reshape(c_out, C_MID).astype(jnp.bfloat16)                     # (Cout, 256)
    shift2d = shift.reshape(C_MID, 1).astype(jnp.float32)
    b2_2d = b2.reshape(c_out, 1).astype(jnp.float32)

    # Keep NCHW: (N, 512, H*W) is a free reshape; tile the pixel (lane) axis.
    x3 = x_nchw.reshape(N, C_IN, hw)
    if hw <= TP_MAX:
        tp, hw_p = hw, hw                    # block == full dim -> always legal, no padding
    else:
        tp = TP_MAX
        hw_p = pl.cdiv(hw, tp) * tp
        if hw_p != hw:
            x3 = jnp.pad(x3, ((0, 0), (0, 0), (0, hw_p - hw)))

    grid = (N, hw_p // tp)
    m_total = N * hw_p
    cost = pl.CostEstimate(
        flops=2 * m_total * (C_IN * C_MID + C_MID * c_out),
        transcendentals=0,
        bytes_accessed=(m_total * C_IN * 4 + m_total * c_out * 4
                        + C_MID * C_IN * 2 + c_out * C_MID * 2
                        + (C_MID + c_out) * 4),
    )

    out3 = pl.pallas_call(
        yolo_head_kernel,
        out_shape=jax.ShapeDtypeStruct((N, c_out, hw_p), x_nchw.dtype),
        grid_spec=pltpu.PrefetchScalarGridSpec(
            num_scalar_prefetch=0,
            grid=grid,
            in_specs=[
                pl.BlockSpec((1, C_IN, tp), lambda n, p: (n, 0, p)),
                pl.BlockSpec((C_MID, C_IN), lambda n, p: (0, 0)),
                pl.BlockSpec((C_MID, 1), lambda n, p: (0, 0)),
                pl.BlockSpec((c_out, C_MID), lambda n, p: (0, 0)),
                pl.BlockSpec((c_out, 1), lambda n, p: (0, 0)),
            ],
            out_specs=pl.BlockSpec((1, c_out, tp), lambda n, p: (n, 0, p)),
        ),
        compiler_params=pltpu.CompilerParams(
            dimension_semantics=("parallel", "parallel")),
        cost_estimate=cost,
    )(x3, w1_bf, shift2d, w2_bf, b2_2d)

    if hw_p != hw:
        out3 = out3[:, :, :hw]
    return out3.reshape(N, c_out, H, W)


def make_params(key, anchors, nc):
    c_out = len(anchors) * (5 + nc)
    ks = jax.random.split(key, 8)
    w1 = jax.random.normal(ks[0], (C_MID, C_IN, 1, 1), jnp.float32) * 0.02
    b1 = jax.random.normal(ks[1], (C_MID,), jnp.float32) * 0.02
    gamma = 1.0 + 0.1 * jax.random.normal(ks[2], (C_MID,), jnp.float32)
    beta = 0.1 * jax.random.normal(ks[3], (C_MID,), jnp.float32)
    running_mean = 0.1 * jax.random.normal(ks[4], (C_MID,), jnp.float32)
    running_var = jnp.abs(1.0 + 0.1 * jax.random.normal(ks[5], (C_MID,), jnp.float32))
    w2 = jax.random.normal(ks[6], (c_out, C_MID, 1, 1), jnp.float32) * 0.02
    b2 = jax.random.normal(ks[7], (c_out,), jnp.float32) * 0.02
    return (w1, b1, gamma, beta, running_mean, running_var, w2, b2)


def reference_forward(x_nchw, params):
    """Plain-JAX f32 reference (same math, NCHW)."""
    w1, b1, gamma, beta, running_mean, running_var, w2, b2 = params
    N, C, H, W = x_nchw.shape
    xr = jnp.transpose(x_nchw, (0, 2, 3, 1)).reshape(-1, C)
    h = xr @ w1.reshape(C_MID, C_IN).T + b1
    h = (h - running_mean) / jnp.sqrt(running_var + EPS) * gamma + beta
    h = jnp.where(h > 0, h, 0.1 * h)
    o = h @ w2.reshape(w2.shape[0], C_MID).T + b2
    return jnp.transpose(o.reshape(N, H, W, -1), (0, 3, 1, 2))


if __name__ == "__main__":
    anchors = [(10, 13), (16, 30), (33, 23)]   # 3 anchors
    nc = 4                                     # 4 classes -> Cout = 3*(5+4) = 27
    img_size = 16

    key = jax.random.PRNGKey(0)
    kx, kp = jax.random.split(key)
    x = jax.random.normal(kx, (2, C_IN, img_size, img_size), jnp.float32)  # NCHW
    params = make_params(kp, anchors, nc)

    out = yolo_layer_forward(x, params)
    out = jax.block_until_ready(out)

    ref = reference_forward(x, params)
    assert out.shape == (2, len(anchors) * (5 + nc), img_size, img_size)
    # bf16 matmul operands with f32 accumulation: max deviation vs the pure-f32
    # reference is a few 1e-3 at these magnitudes (|out| ~ 0.1); use 2e-2 bound.
    err = float(jnp.max(jnp.abs(out - ref)))
    assert err < 2e-2, f"mismatch vs reference: max abs err = {err}"

    print("KERNEL_OK")
</pallas_src>

<mosaic_0001>
module attributes {stable_mosaic.version = 11 : i64} {
  func.func @yolo_head_kernel(%arg0: i32, %arg1: i32, %arg2: memref<1x512x256xf32, #tpu.memory_space<vmem>>, %arg3: memref<256x512xbf16, #tpu.memory_space<vmem>>, %arg4: memref<256x1xf32, #tpu.memory_space<vmem>>, %arg5: memref<27x256xbf16, #tpu.memory_space<vmem>>, %arg6: memref<27x1xf32, #tpu.memory_space<vmem>>, %arg7: memref<1x27x256xf32, #tpu.memory_space<vmem>>) attributes {dimension_semantics = [#tpu.dimension_semantics<parallel>, #tpu.dimension_semantics<parallel>], iteration_bounds = array<i64: 2, 1>, scalar_prefetch = 0 : i64, scratch_operands = 0 : i64, tpu.core_type = #tpu.core_type<tc>, window_params = [{transform_indices = @transform_0, window_bounds = array<i64: 1, 512, 256>}, {pipeline_mode = #tpu.pipeline_mode<synchronous>, transform_indices = @transform_1, window_bounds = array<i64: 256, 512>}, {pipeline_mode = #tpu.pipeline_mode<synchronous>, transform_indices = @transform_2, window_bounds = array<i64: 256, 1>}, {pipeline_mode = #tpu.pipeline_mode<synchronous>, transform_indices = @transform_3, window_bounds = array<i64: 27, 256>}, {pipeline_mode = #tpu.pipeline_mode<synchronous>, transform_indices = @transform_4, window_bounds = array<i64: 27, 1>}, {transform_indices = @transform_5, window_bounds = array<i64: 1, 27, 256>}]} {
    %c0 = arith.constant 0 : index
    %c0_0 = arith.constant 0 : index
    %c0_1 = arith.constant 0 : index
    %0 = vector.load %arg2[%c0, %c0_0, %c0_1] : memref<1x512x256xf32, #tpu.memory_space<vmem>>, vector<1x512x256xf32>
    %1 = vector.shape_cast %0 : vector<1x512x256xf32> to vector<512x256xf32>
    %2 = arith.truncf %1 : vector<512x256xf32> to vector<512x256xbf16>
    %c0_2 = arith.constant 0 : index
    %c0_3 = arith.constant 0 : index
    %3 = vector.load %arg3[%c0_2, %c0_3] : memref<256x512xbf16, #tpu.memory_space<vmem>>, vector<256x512xbf16>
    %cst = arith.constant dense<0.000000e+00> : vector<256x256xf32>
    %4 = tpu.matmul %3, %2, %cst {dimension_numbers = #tpu.dot_dimension_numbers<[1], [0], [0], [1], [0, 0, 1, 1], [], []>} : vector<256x512xbf16>, vector<512x256xbf16>, vector<256x256xf32> -> vector<256x256xf32>
    %c0_4 = arith.constant 0 : index
    %c0_5 = arith.constant 0 : index
    %5 = vector.load %arg4[%c0_4, %c0_5] : memref<256x1xf32, #tpu.memory_space<vmem>>, vector<256x1xf32>
    %6 = vector.broadcast %5 : vector<256x1xf32> to vector<256x256xf32>
    %7 = arith.addf %4, %6 : vector<256x256xf32>
    %cst_6 = arith.constant 0.000000e+00 : f32
    %8 = vector.broadcast %cst_6 : f32 to vector<256x256xf32>
    %9 = arith.cmpf ogt, %7, %8 : vector<256x256xf32>
    %cst_7 = arith.constant 1.000000e-01 : f32
    %10 = vector.broadcast %cst_7 : f32 to vector<256x256xf32>
    %11 = arith.mulf %10, %7 : vector<256x256xf32>
    %12 = arith.select %9, %7, %11 : vector<256x256xi1>, vector<256x256xf32>
    %c0_8 = arith.constant 0 : index
    %c0_9 = arith.constant 0 : index
    %13 = vector.load %arg5[%c0_8, %c0_9] : memref<27x256xbf16, #tpu.memory_space<vmem>>, vector<27x256xbf16>
    %14 = arith.truncf %12 : vector<256x256xf32> to vector<256x256xbf16>
    %cst_10 = arith.constant dense<0.000000e+00> : vector<27x256xf32>
    %15 = tpu.matmul %13, %14, %cst_10 {dimension_numbers = #tpu.dot_dimension_numbers<[1], [0], [0], [1], [0, 0, 1, 1], [], []>} : vector<27x256xbf16>, vector<256x256xbf16>, vector<27x256xf32> -> vector<27x256xf32>
    %c0_11 = arith.constant 0 : index
    %c0_12 = arith.constant 0 : index
    %16 = vector.load %arg6[%c0_11, %c0_12] : memref<27x1xf32, #tpu.memory_space<vmem>>, vector<27x1xf32>
    %17 = vector.broadcast %16 : vector<27x1xf32> to vector<27x256xf32>
    %18 = arith.addf %15, %17 : vector<27x256xf32>
    %c0_13 = arith.constant 0 : index
    %c0_14 = arith.constant 0 : index
    %c0_15 = arith.constant 0 : index
    %19 = vector.load %arg7[%c0_13, %c0_14, %c0_15] : memref<1x27x256xf32, #tpu.memory_space<vmem>>, vector<1x27x256xf32>
    %20 = vector.shape_cast %19 : vector<1x27x256xf32> to vector<27x256xf32>
    %21 = vector.shape_cast %18 : vector<27x256xf32> to vector<1x27x256xf32>
    tpu.vector_store %arg7[%c0_13, %c0_14, %c0_15], %21 {strides = array<i32>} : memref<1x27x256xf32, #tpu.memory_space<vmem>>, vector<1x27x256xf32>,
    return
  }
  func.func @transform_0(%arg0: i32, %arg1: i32) -> (i32, i32, i32) {
    %c0_i32 = arith.constant 0 : i32
    %c0_i32_0 = arith.constant 0 : i32
    return %arg0, %c0_i32, %arg1 : i32, i32, i32
  }
  func.func @transform_1(%arg0: i32, %arg1: i32) -> (i32, i32) {
    %c0_i32 = arith.constant 0 : i32
    %c0_i32_0 = arith.constant 0 : i32
    %c0_i32_1 = arith.constant 0 : i32
    return %c0_i32, %c0_i32_0 : i32, i32
  }
  func.func @transform_2(%arg0: i32, %arg1: i32) -> (i32, i32) {
    %c0_i32 = arith.constant 0 : i32
    %c0_i32_0 = arith.constant 0 : i32
    %c0_i32_1 = arith.constant 0 : i32
    return %c0_i32, %c0_i32_0 : i32, i32
  }
  func.func @transform_3(%arg0: i32, %arg1: i32) -> (i32, i32) {
    %c0_i32 = arith.constant 0 : i32
    %c0_i32_0 = arith.constant 0 : i32
    %c0_i32_1 = arith.constant 0 : i32
    return %c0_i32, %c0_i32_0 : i32, i32
  }
  func.func @transform_4(%arg0: i32, %arg1: i32) -> (i32, i32) {
    %c0_i32 = arith.constant 0 : i32
    %c0_i32_0 = arith.constant 0 : i32
    %c0_i32_1 = arith.constant 0 : i32
    return %c0_i32, %c0_i32_0 : i32, i32
  }
  func.func @transform_5(%arg0: i32, %arg1: i32) -> (i32, i32, i32) {
    %c0_i32 = arith.constant 0 : i32
    %c0_i32_0 = arith.constant 0 : i32
    return %arg0, %c0_i32, %arg1 : i32, i32, i32
  }
}

</mosaic_0001>

<bundles_post_ra>
// kernel: tpu_custom_call.1
= control target key start
LH: loop header
LB: loop body
LE: loop exit
PB: predicated region body
PF: predicated region fallthrough
CT: control target
= control target key end

     0   :  { %10 = vsyncpa [#allocation3], 0  ;;  %s3250_s0 = inlined_call_operand.hbm [shape: f32[2,512,256], index: 0, kind: input, shape index: {}]   ;;  %s3251_s1 = inlined_call_operand.hbm [shape: bf16[256,512], index: 1, kind: input, shape index: {}]   ;;  %s3252_s2 = inlined_call_operand.vmem [shape: f32[256,1], index: 2, kind: input, shape index: {}]   ;;  %s3253_s3 = inlined_call_operand.vmem [shape: bf16[27,256], index: 3, kind: input, shape index: {}]   ;;  %s3254_s4 = inlined_call_operand.vmem [shape: f32[27,1], index: 4, kind: input, shape index: {}]   ;;  %s3255_s5 = inlined_call_operand.vmem [shape: f32[2,27,256], index: 5, kind: output, shape index: {}]  }
   0x1   :  { %12 = vsyncpa [#allocation3 + $0x1], 0 }
   0x2   :  { %13 = vsyncpa [#allocation5], 0  ;;  %s2447_s18 = smov 0   ;;  %s2449_s19 = smov 0  }
   0x3   :  { %s2451_s20 = smov 0   ;;  %s2453_s21 = smov 0  }
   0x4   :  { %s2455_s22 = smov 0   ;;  %s2457_s23 = smov 0  }
   0x5 LB: > { %s1880_s24 = sadd.s32 4294967295, %s2410_s23   ;;  %p53_p0 = scmp.ne.s32.totalorder %s2394_s19, %s2390_s18  ;;  %s2410_s23 = sphi %s2457_s23, %s19_s23   ;;  %s2406_s22 = sphi %s2455_s22, %s3356_s22   ;;  %s2402_s21 = sphi %s2453_s21, %s3355_s21   ;;  %s2398_s20 = sphi %s2451_s20, %s3354_s20   ;;  %s2394_s19 = sphi %s2449_s19, %s3353_s19   ;;  %s2390_s18 = sphi %s2447_s18, %s3352_s18  }
   0x6   : > { %p2477_p1 = scmp.eq.s32.totalorder %s1880_s24, 0  ;;  %p1882_p2 = scmp.ge.s32.totalorder %s2410_s23, 1 }
   0x7   : > { %p176_p3 = scmp.lt.s32.totalorder %s2410_s23, 3  ;;  %s2412_s28 = smov [#allocation4]  }
   0x8   : > { %s3279_s25 = scalar_select %p2477_p1, 1, 0 }
   0x9   : > { %p2485_p4 = por %p2477_p1, %p53_p0  ;;  %p2489_p5 = pnand %p1882_p2, %p176_p3 }
   0xa   : > { %s188_s29 = sshll.u32 %s2412_s28, 4  ;;  %s31_s6 = sadd.s32 1, %s2406_s22  ;;  %s189_s29 = int_to_ptr.vmem [resolvable:$true] %s188_s29 }
   0xb   : > { %s3280_s26 = scalar_select %p2485_p4, 1, 0 }
   0xc   : > { %s3281_s27 = scalar_select %p2489_p5, 1, 0 }
   0xd   : > { %p2131_p6 = pneg %p2489_p5  ;;  %s2298_s9 = scalar_lea.hbm %s3251_s1, 8192 }
   0xe   : > { %p2299_p8 = scmp.ne.s32.totalorder %s3251_s1, %s2298_s9  ;;  %p2305_p12 = scmp.lt.u32.totalorder %s2298_s9, %s3251_s1 }
   0xf   : > { %p2497_p7 = pnand %p2131_p6, %p2477_p1 }
  0x11   : > { %p2300_p9 = pneg %p2497_p7 }
  0x13   : > { %p2301_p10 = pnand %p2300_p9, %p2299_p8 }
  0x15   : > { %p2302_p11 = pneg %p2301_p10 }
  0x17   : > { %p2307_p13 = pnand %p2305_p12, %p2302_p11 }
  0x19   : > { %2310 = shalt.err (!%p2307_p13)
}
  0x1a   : > { %s2311_s14 = scalar_lea.vmem %s189_s29, 8192  ;;  %p2319_p6 = scmp.lt.s32.totalorder %s189_s29, %s189_s29 }
  0x1b   : > { %p2312_p0 = scmp.ne.s32.totalorder %s189_s29, %s2311_s14  ;;  %p2320_p1 = scmp.lt.s32.totalorder %s2311_s14, %s2311_s14 }
  0x1d   : > { %p2314_p2 = pnand %p2312_p0, %p2300_p9  ;;  %p2321_p4 = por %p2320_p1, %p2319_p6 }
  0x1f   : > { %p2315_p3 = pneg %p2314_p2 }
  0x21   : > { %p2322_p5 = pnand %p2321_p4, %p2315_p3 }
  0x23   : > { %2325 = shalt.err (!%p2322_p5)
}
  0x24   : > { %s2413_s15 = smov 256   ;;  %s2414_s16 = smov 16  }
  0x25   : > { %2134 = dma.hbm_to_vmem [thread:$0]  (!%p2497_p7), %s3251_s1, 8192, %s189_s29, [#allocation5], %s2413_s15, %s2413_s15, %s2414_s16  }
  0x26   : > { %p33_p1 = scmp.ge.s32.totalorder %s31_s6, 2  ;;  %s40_s24 = sadd.s32 1, %s2398_s20 }
  0x27   : > { %p47_p4 = scmp.ne.s32.totalorder %s2398_s20, %s2394_s19  ;;  %p48_p5 = scmp.eq.s32.totalorder %s2410_s23, 0 }
  0x28   : > { %s3358_s6 = smov (%p33_p1, %s31_s6), 0  ;;  %p2140_p9 = scmp.lt.s32.totalorder %s2410_s23, 2 }
  0x29   : > { %p49_p8 = por %p48_p5, %p47_p4  ;;  %s35_s28 = ssub.s32 %s2406_s22, %s3358_s6 }
  0x2a   : > { %s211_s7 = sand.u32 1, %s2398_s20   ;;  %p38_p10 = scmp.eq.s32.totalorder %s35_s28, 0 }
  0x2b   : > { %s1885_s30 = sshll.u32 %s211_s7, 10  ;;  %s1963_s8 = sshll.u32 %s2406_s22, 14 }
  0x2c   : > { %s2533_s9 = scalar_select %p38_p10, %s2398_s20, %s40_s24  }
  0x2d   : > { %s2538_s29 = scalar_lea.hbm %s3250_s0, %s1963_s8  ;;  %s215_s12 = scalar_lea.vmem [#allocation2], %s1885_s30 }
  0x2e   : > { %s224_s13 = sshll.u32 %s215_s12, 4  ;;  %p2540_p7 = pnand %p2140_p9, %p49_p8  ;;  %s2544_s13 = int_to_ptr.vmem [resolvable:$true] %s224_s13 }
  0x2f   : > { %s2546_s17 = scalar_lea.sflag [#allocation3], %s211_s7  ;;  %s2326_s18 = scalar_lea.hbm %s2538_s29, 16384 }
  0x30   : > { %p2327_p11 = scmp.ne.s32.totalorder %s2538_s29, %s2326_s18  ;;  %p2328_p12 = pneg %p2540_p7 }
  0x31   : > { %s2331_s30 = scalar_lea.hbm %s3250_s0, 32768  ;;  %p2332_p2 = scmp.lt.u32.totalorder %s2538_s29, %s3250_s0 }
  0x32   : > { %p2329_p13 = pnand %p2328_p12, %p2327_p11  ;;  %p2333_p3 = scmp.lt.u32.totalorder %s2331_s30, %s2326_s18 }
  0x33   : > { %p2335_p1 = scmp.lt.u32.totalorder %s2326_s18, %s2538_s29 }
  0x34   : > { %p2330_p0 = pneg %p2329_p13  ;;  %p2334_p6 = por %p2333_p3, %p2332_p2 }
  0x36   : > { %p2336_p4 = por %p2335_p1, %p2334_p6 }
  0x38   : > { %p2337_p5 = pnand %p2336_p4, %p2330_p0 }
  0x3a   : > { %2340 = shalt.err (!%p2337_p5)
}
  0x3b   : > { %s2341_s7 = scalar_lea.vmem %s2544_s13, 16384  ;;  %s2415_s11 = smov [#allocation2]  }
  0x3c   : > { %p2342_p8 = scmp.ne.s32.totalorder %s2544_s13, %s2341_s7  ;;  %s2346_s12 = sshll.u32 %s2415_s11, 4  ;;  %s2347_s12 = int_to_ptr.vmem [resolvable:$false] %s2346_s12 }
  0x3d   : > { %s2348_s24 = scalar_lea.vmem %s2347_s12, 32768  ;;  %p2349_p11 = scmp.lt.s32.totalorder %s2544_s13, %s2347_s12 }
  0x3e   : > { %p2344_p9 = pnand %p2342_p8, %p2328_p12  ;;  %p2350_p13 = scmp.lt.s32.totalorder %s2348_s24, %s2341_s7 }
  0x40   : > { %p2345_p10 = pneg %p2344_p9  ;;  %p2351_p2 = por %p2350_p13, %p2349_p11 }
  0x42   : > { %p2352_p3 = pnand %p2351_p2, %p2345_p10 }
  0x44   : > { %2355 = shalt.err (!%p2352_p3)
}
  0x45   : > { %2138 = dma.hbm_to_vmem [thread:$0]  (!%p2540_p7), %s2538_s29, 16384, %s2544_s13, %s2546_s17, %s2413_s15, %s2413_s15, %s2414_s16  }
  0x46   : > { %p3284_p12 = scmp.ne.s32.totalorder %s3281_s27, 0 }
  0x48   : > { %236 = sbr.rel (%p3284_p12) target bundleno = 793 (0x319), region = 40 }
  0x4f   : > { %s238_s18 = sand.u32 1, %s2394_s19   ;;  %p3285_p0 = scmp.ne.s32.totalorder %s3280_s26, 0 }
  0x50   : > { %s1889_s28 = sshll.u32 %s238_s18, 10  ;;  %s239_s30 = scalar_lea.sflag [#allocation3], %s238_s18 }
  0x51   : > { %s2580_s8 = scalar_lea.vmem [#allocation2], %s1889_s28 }
  0x52   : > { %2381 = dma.done.wait (%p3285_p0), %s239_s30, 16384  }
  0x53   : > { %2383 = vsyncadd (%p3285_p0), %s239_s30, 4294950912  ;;  %p3286_p6 = scmp.ne.s32.totalorder %s3279_s25, 0 }
  0x55   : > { %2385 = dma.done.wait (%p3286_p6), [#allocation5], 8192  }
  0x56   : > { %2387 = vsyncadd (%p3286_p6), [#allocation5], 4294959104  ;;  %v289_v0 = vld [vmem:[%s2580_s8 + $0x8] sm:$0xff]  ;;  %v291_v1 = vld [vmem:[%s2580_s8 + $0x18] sm:$0xff]  ;;  %p279_p7 = scmp.lt.s32.totalorder %s2402_s21, 1 }
  0x57   : > { %v288_v2 = vld [vmem:[%s2580_s8] sm:$0xff]  ;;  %v417_v3 = vpack.c.bf16 %v291_v1, %v289_v0  ;;  %v290_v4 = vld [vmem:[%s2580_s8 + $0x10] sm:$0xff]  ;;  %v293_v5 = vld [vmem:[%s2580_s8 + $0x28] sm:$0xff] }
  0x58   : > { %v295_v6 = vld [vmem:[%s2580_s8 + $0x38] sm:$0xff]  ;;  %v416_v7 = vpack.c.bf16 %v290_v4, %v288_v2  ;;  %v292_v9 = vld [vmem:[%s2580_s8 + $0x20] sm:$0xff]  ;;  %v294_v10 = vld [vmem:[%s2580_s8 + $0x30] sm:$0xff]  ;;  %s3360_s21 = smov (!%p279_p7, %s2402_s21), 1 }
  0x59   : > { %v419_v8 = vpack.c.bf16 %v295_v6, %v293_v5  ;;  %v297_v11 = vld [vmem:[%s2580_s8 + $0x48] sm:$0xff]  ;;  %1056 = vmatprep.subr.bf16.mxu0 %v417_v3  ;;  %v299_v12 = vld [vmem:[%s2580_s8 + $0x58] sm:$0xff]  ;;  %v418_v13 = vpack.c.bf16 %v294_v10, %v292_v9  ;;  %v352_v16 = vld [vmem:[%s2580_s8 + $0x200] sm:$0xff]  ;;  %s1964_s17 = sshll.u32 %s3360_s21, 6 }
  0x5a   : > { %1057 = vmatpush1.bf16.msra.mxu0 %v416_v7  ;;  %v353_v14 = vld [vmem:[%s2580_s8 + $0x208] sm:$0xff]  ;;  %v355_v15 = vld [vmem:[%s2580_s8 + $0x218] sm:$0xff]  ;;  %v421_v17 = vpack.c.bf16 %v299_v12, %v297_v11  ;;  %v296_v18 = vld [vmem:[%s2580_s8 + $0x40] sm:$0xff]  ;;  %s286_s11 = scalar_lea.vmem %s3255_s5, %s1964_s17 }
  0x5b   : > { %1058 = vmatprep.subr.bf16.mxu0 %v419_v8  ;;  %v298_v19 = vld [vmem:[%s2580_s8 + $0x50] sm:$0xff]  ;;  %v2605_v20 = vpack.c.bf16 %v355_v15, %v353_v14  ;;  %v301_v23 = vld [vmem:[%s2580_s8 + $0x68] sm:$0xff]  ;;  %v303_v24 = vld [vmem:[%s2580_s8 + $0x78] sm:$0xff] }
  0x5c   : > { %v354_v21 = vld [vmem:[%s2580_s8 + $0x210] sm:$0xff]  ;;  %v357_v25 = vld [vmem:[%s2580_s8 + $0x228] sm:$0xff]  ;;  %v359_v26 = vld [vmem:[%s2580_s8 + $0x238] sm:$0xff]  ;;  %v420_v29 = vpack.c.bf16 %v298_v19, %v296_v18  ;;  %v423_v34 = vpack.c.bf16 %v303_v24, %v301_v23 }
  0x5d   : > { %v2608_v22 = vpack.c.bf16 %v354_v21, %v352_v16  ;;  %1965 = vmatprep.subr.bf16.mxu1 %v2605_v20  ;;  %v356_v27 = vld [vmem:[%s2580_s8 + $0x220] sm:$0xff]  ;;  %v358_v28 = vld [vmem:[%s2580_s8 + $0x230] sm:$0xff]  ;;  %v2620_v32 = vpack.c.bf16 %v359_v26, %v357_v25  ;;  %v305_v35 = vld [vmem:[%s2580_s8 + $0x88] sm:$0xff] }
  0x5e   : > { %1059 = vmatpush1.bf16.msra.mxu0 %v418_v13  ;;  %v300_v30 = vld [vmem:[%s2580_s8 + $0x60] sm:$0xff]  ;;  %v302_v31 = vld [vmem:[%s2580_s8 + $0x70] sm:$0xff]  ;;  %v2622_v33 = vpack.c.bf16 %v358_v28, %v356_v27  ;;  %v361_v36 = vld [vmem:[%s2580_s8 + $0x248] sm:$0xff] }
  0x5f   : > { %1981 = vmatpush1.bf16.msra.mxu1 %v2608_v22  ;;  %1060 = vmatprep.subr.bf16.mxu0 %v421_v17  ;;  %v363_v37 = vld [vmem:[%s2580_s8 + $0x258] sm:$0xff]  ;;  %v360_v40 = vld [vmem:[%s2580_s8 + $0x240] sm:$0xff]  ;;  %v362_v41 = vld [vmem:[%s2580_s8 + $0x250] sm:$0xff]  ;;  %v422_v42 = vpack.c.bf16 %v302_v31, %v300_v30 }
  0x60   : > { %1966 = vmatprep.subr.bf16.mxu1 %v2620_v32  ;;  %v307_v38 = vld [vmem:[%s2580_s8 + $0x98] sm:$0xff]  ;;  %v2629_v39 = vpack.c.bf16 %v363_v37, %v361_v36  ;;  %v304_v43 = vld [vmem:[%s2580_s8 + $0x80] sm:$0xff]  ;;  %v2635_v44 = vpack.c.bf16 %v362_v41, %v360_v40  ;;  %v365_v45 = vld [vmem:[%s2580_s8 + $0x268] sm:$0xff] }
  0x61   : > { %v367_v46 = vld [vmem:[%s2580_s8 + $0x278] sm:$0xff]  ;;  %v425_v47 = vpack.c.bf16 %v307_v38, %v305_v35  ;;  %v306_v48 = vld [vmem:[%s2580_s8 + $0x90] sm:$0xff]  ;;  %v364_v50 = vld [vmem:[%s2580_s8 + $0x260] sm:$0xff] }
  0x62   : > { %1061 = vmatpush1.bf16.msra.mxu0 %v420_v29  ;;  %v2641_v49 = vpack.c.bf16 %v367_v46, %v365_v45  ;;  %v366_v51 = vld [vmem:[%s2580_s8 + $0x270] sm:$0xff]  ;;  %v309_v52 = vld [vmem:[%s2580_s8 + $0xa8] sm:$0xff]  ;;  %v311_v53 = vld [vmem:[%s2580_s8 + $0xb8] sm:$0xff]  ;;  %v424_v56 = vpack.c.bf16 %v306_v48, %v304_v43  ;;  %v2416_v46 = vmov 0  }
  0x63   : > { %1982 = vmatpush1.bf16.msra.mxu1 %v2622_v33  ;;  %1062 = vmatprep.subr.bf16.mxu0 %v423_v34  ;;  %v369_v54 = vld [vmem:[%s2580_s8 + $0x288] sm:$0xff]  ;;  %v371_v55 = vld [vmem:[%s2580_s8 + $0x298] sm:$0xff]  ;;  %v308_v57 = vld [vmem:[%s2580_s8 + $0xa0] sm:$0xff]  ;;  %v2652_v59 = vpack.c.bf16 %v366_v51, %v364_v50  ;;  %v427_v60 = vpack.c.bf16 %v311_v53, %v309_v52 }
  0x64   : > { %1967 = vmatprep.subr.bf16.mxu1 %v2629_v39  ;;  %v310_v58 = vld [vmem:[%s2580_s8 + $0xb0] sm:$0xff]  ;;  %v313_v61 = vld [vmem:[%s2580_s8 + $0xc8] sm:$0xff]  ;;  %v2656_v62 = vpack.c.bf16 %v371_v55, %v369_v54  ;;  %v368_v63 = vld [vmem:[%s2580_s8 + $0x280] sm:$0xff]  ;;  %2195 = vset.pattern.permute.xlu1 %v2416_v46 }
  0x65   : > { %v370_v0 = vld [vmem:[%s2580_s8 + $0x290] sm:$0xff]  ;;  %v315_v1 = vld [vmem:[%s2580_s8 + $0xd8] sm:$0xff]  ;;  %v373_v2 = vld [vmem:[%s2580_s8 + $0x2a8] sm:$0xff]  ;;  %v426_v4 = vpack.c.bf16 %v310_v58, %v308_v57  ;;  %2194 = vset.pattern.permute.xlu0 %v2416_v46 }
  0x66   : > { %1063 = vmatpush1.bf16.msra.mxu0 %v422_v42  ;;  %v375_v3 = vld [vmem:[%s2580_s8 + $0x2b8] sm:$0xff]  ;;  %v312_v5 = vld [vmem:[%s2580_s8 + $0xc0] sm:$0xff]  ;;  %v314_v6 = vld [vmem:[%s2580_s8 + $0xd0] sm:$0xff]  ;;  %v2666_v7 = vpack.c.bf16 %v370_v0, %v368_v63  ;;  %v429_v8 = vpack.c.bf16 %v315_v1, %v313_v61 }
  0x67   : > { %1983 = vmatpush1.bf16.msra.mxu1 %v2635_v44  ;;  %1064 = vmatprep.subr.bf16.mxu0 %v425_v47  ;;  %v317_v9 = vld [vmem:[%s2580_s8 + $0xe8] sm:$0xff]  ;;  %v2670_v10 = vpack.c.bf16 %v375_v3, %v373_v2  ;;  %v372_v11 = vld [vmem:[%s2580_s8 + $0x2a0] sm:$0xff]  ;;  %v374_v12 = vld [vmem:[%s2580_s8 + $0x2b0] sm:$0xff]  ;;  %v428_v16 = vpack.c.bf16 %v314_v6, %v312_v5 }
  0x68   : > { %1968 = vmatprep.subr.bf16.mxu1 %v2641_v49  ;;  %v319_v13 = vld [vmem:[%s2580_s8 + $0xf8] sm:$0xff]  ;;  %v377_v14 = vld [vmem:[%s2580_s8 + $0x2c8] sm:$0xff]  ;;  %v316_v17 = vld [vmem:[%s2580_s8 + $0xe0] sm:$0xff]  ;;  %v2680_v19 = vpack.c.bf16 %v374_v12, %v372_v11 }
  0x69   : > { %v379_v15 = vld [vmem:[%s2580_s8 + $0x2d8] sm:$0xff]  ;;  %v318_v18 = vld [vmem:[%s2580_s8 + $0xf0] sm:$0xff]  ;;  %v431_v21 = vpack.c.bf16 %v319_v13, %v317_v9  ;;  %v321_v23 = vld [vmem:[%s2580_s8 + $0x108] sm:$0xff] }
  0x6a   : > { %1065 = vmatpush1.bf16.msra.mxu0 %v424_v56  ;;  %v2684_v24 = vpack.c.bf16 %v379_v15, %v377_v14  ;;  %v376_v25 = vld [vmem:[%s2580_s8 + $0x2c0] sm:$0xff]  ;;  %v378_v26 = vld [vmem:[%s2580_s8 + $0x2d0] sm:$0xff]  ;;  %v323_v27 = vld [vmem:[%s2580_s8 + $0x118] sm:$0xff]  ;;  %v430_v30 = vpack.c.bf16 %v318_v18, %v316_v17 }
  0x6b   : > { %1984 = vmatpush1.bf16.msra.mxu1 %v2652_v59  ;;  %1066 = vmatprep.subr.bf16.mxu0 %v427_v60  ;;  %v381_v28 = vld [vmem:[%s2580_s8 + $0x2e8] sm:$0xff]  ;;  %v383_v29 = vld [vmem:[%s2580_s8 + $0x2f8] sm:$0xff]  ;;  %v320_v31 = vld [vmem:[%s2580_s8 + $0x100] sm:$0xff]  ;;  %v2694_v35 = vpack.c.bf16 %v378_v26, %v376_v25  ;;  %v433_v36 = vpack.c.bf16 %v323_v27, %v321_v23 }
  0x6c   : > { %1969 = vmatprep.subr.bf16.mxu1 %v2656_v62  ;;  %v322_v34 = vld [vmem:[%s2580_s8 + $0x110] sm:$0xff]  ;;  %v325_v37 = vld [vmem:[%s2580_s8 + $0x128] sm:$0xff]  ;;  %v2698_v38 = vpack.c.bf16 %v383_v29, %v381_v28  ;;  %v380_v40 = vld [vmem:[%s2580_s8 + $0x2e0] sm:$0xff] }
  0x6d   : > { %v382_v41 = vld [vmem:[%s2580_s8 + $0x2f0] sm:$0xff]  ;;  %v327_v42 = vld [vmem:[%s2580_s8 + $0x138] sm:$0xff]  ;;  %v385_v43 = vld [vmem:[%s2580_s8 + $0x308] sm:$0xff]  ;;  %v432_v47 = vpack.c.bf16 %v322_v34, %v320_v31 }
  0x6e   : > { %1067 = vmatpush1.bf16.msra.mxu0 %v426_v4  ;;  %v387_v45 = vld [vmem:[%s2580_s8 + $0x318] sm:$0xff]  ;;  %v324_v48 = vld [vmem:[%s2580_s8 + $0x120] sm:$0xff]  ;;  %v326_v50 = vld [vmem:[%s2580_s8 + $0x130] sm:$0xff]  ;;  %v2708_v51 = vpack.c.bf16 %v382_v41, %v380_v40  ;;  %v435_v52 = vpack.c.bf16 %v327_v42, %v325_v37 }
  0x6f   : > { %1985 = vmatpush1.bf16.msra.mxu1 %v2666_v7  ;;  %1068 = vmatprep.subr.bf16.mxu0 %v429_v8  ;;  %v329_v53 = vld [vmem:[%s2580_s8 + $0x148] sm:$0xff]  ;;  %v2712_v54 = vpack.c.bf16 %v387_v45, %v385_v43  ;;  %v384_v55 = vld [vmem:[%s2580_s8 + $0x300] sm:$0xff]  ;;  %v386_v56 = vld [vmem:[%s2580_s8 + $0x310] sm:$0xff]  ;;  %v434_v61 = vpack.c.bf16 %v326_v50, %v324_v48 }
  0x70   : > { %1970 = vmatprep.subr.bf16.mxu1 %v2670_v10  ;;  %v331_v57 = vld [vmem:[%s2580_s8 + $0x158] sm:$0xff]  ;;  %v389_v58 = vld [vmem:[%s2580_s8 + $0x328] sm:$0xff]  ;;  %v328_v63 = vld [vmem:[%s2580_s8 + $0x140] sm:$0xff]  ;;  %v2722_v1 = vpack.c.bf16 %v386_v56, %v384_v55 }
  0x71   : > { %v391_v60 = vld [vmem:[%s2580_s8 + $0x338] sm:$0xff]  ;;  %v330_v0 = vld [vmem:[%s2580_s8 + $0x150] sm:$0xff]  ;;  %v437_v2 = vpack.c.bf16 %v331_v57, %v329_v53  ;;  %v333_v3 = vld [vmem:[%s2580_s8 + $0x168] sm:$0xff] }
  0x72   : > { %1069 = vmatpush1.bf16.msra.mxu0 %v428_v16  ;;  %v2726_v4 = vpack.c.bf16 %v391_v60, %v389_v58  ;;  %v388_v5 = vld [vmem:[%s2580_s8 + $0x320] sm:$0xff]  ;;  %v390_v6 = vld [vmem:[%s2580_s8 + $0x330] sm:$0xff]  ;;  %v335_v8 = vld [vmem:[%s2580_s8 + $0x178] sm:$0xff]  ;;  %v436_v12 = vpack.c.bf16 %v330_v0, %v328_v63 }
  0x73   : > { %1986 = vmatpush1.bf16.msra.mxu1 %v2680_v19  ;;  %1070 = vmatprep.subr.bf16.mxu0 %v431_v21  ;;  %v393_v9 = vld [vmem:[%s2580_s8 + $0x348] sm:$0xff]  ;;  %v395_v11 = vld [vmem:[%s2580_s8 + $0x358] sm:$0xff]  ;;  %v332_v13 = vld [vmem:[%s2580_s8 + $0x160] sm:$0xff]  ;;  %v2736_v15 = vpack.c.bf16 %v390_v6, %v388_v5  ;;  %v439_v17 = vpack.c.bf16 %v335_v8, %v333_v3 }
  0x74   : > { %1971 = vmatprep.subr.bf16.mxu1 %v2684_v24  ;;  %v334_v14 = vld [vmem:[%s2580_s8 + $0x170] sm:$0xff]  ;;  %v337_v18 = vld [vmem:[%s2580_s8 + $0x188] sm:$0xff]  ;;  %v2740_v21 = vpack.c.bf16 %v395_v11, %v393_v9  ;;  %v392_v23 = vld [vmem:[%s2580_s8 + $0x340] sm:$0xff] }
  0x75   : > { %v2198_v16 = vld [vmem:[#allocation4 + $0x4] ss:$16 sps:$4 sm:$0xff]   ;;  %v339_v26 = vld [vmem:[%s2580_s8 + $0x198] sm:$0xff]  ;;  %v397_v27 = vld [vmem:[%s2580_s8 + $0x368] sm:$0xff]  ;;  %v438_v31 = vpack.c.bf16 %v334_v14, %v332_v13 }
  0x76   : > { %1071 = vmatpush1.bf16.msra.mxu0 %v430_v30  ;;  %v394_v25 = vld [vmem:[%s2580_s8 + $0x350] sm:$0xff]  ;;  %v399_v28 = vld [vmem:[%s2580_s8 + $0x378] sm:$0xff]  ;;  %1088 = vmatprep.mubr.bf16.mxu0 %v2198_v16  ;;  %v336_v29 = vld [vmem:[%s2580_s8 + $0x180] sm:$0xff]  ;;  %v441_v42 = vpack.c.bf16 %v339_v26, %v337_v18 }
  0x77   : > { %1987 = vmatpush1.bf16.msra.mxu1 %v2694_v35  ;;  %1072 = vmatprep.subr.bf16.mxu0 %v433_v36  ;;  %v338_v30 = vld [vmem:[%s2580_s8 + $0x190] sm:$0xff]  ;;  %v2750_v34 = vpack.c.bf16 %v394_v25, %v392_v23  ;;  %v341_v36 = vld [vmem:[%s2580_s8 + $0x1a8] sm:$0xff]  ;;  %v343_v37 = vld [vmem:[%s2580_s8 + $0x1b8] sm:$0xff]  ;;  %v2757_v43 = vpack.c.bf16 %v399_v28, %v397_v27 }
  0x78   : > { %1972 = vmatprep.subr.bf16.mxu1 %v2698_v38  ;;  %v396_v40 = vld [vmem:[%s2580_s8 + $0x360] sm:$0xff]  ;;  %v398_v41 = vld [vmem:[%s2580_s8 + $0x370] sm:$0xff]  ;;  %v401_v45 = vld [vmem:[%s2580_s8 + $0x388] sm:$0xff]  ;;  %v443_v58 = vpack.c.bf16 %v343_v37, %v341_v36 }
  0x79   : > { %v403_v46 = vld [vmem:[%s2580_s8 + $0x398] sm:$0xff]  ;;  %v340_v48 = vld [vmem:[%s2580_s8 + $0x1a0] sm:$0xff]  ;;  %v342_v50 = vld [vmem:[%s2580_s8 + $0x1b0] sm:$0xff]  ;;  %v2764_v53 = vpack.c.bf16 %v398_v41, %v396_v40 }
  0x7a   : > { %1073 = vmatpush1.bf16.msra.mxu0 %v432_v47  ;;  %v2204_v47 = vld [vmem:[#allocation4 + $0x2c] ss:$16 sps:$4 sm:$0xff]   ;;  %v400_v57 = vld [vmem:[%s2580_s8 + $0x380] sm:$0xff]  ;;  %v2770_v60 = vpack.c.bf16 %v403_v46, %v401_v45  ;;  %v346_v3 = vld [vmem:[%s2580_s8 + $0x1d0] sm:$0xff]  ;;  %v442_v5 = vpack.c.bf16 %v342_v50, %v340_v48 }
  0x7b   : > { %1988 = vmatpush1.bf16.msra.mxu1 %v2708_v51  ;;  %1074 = vmatprep.subr.bf16.mxu0 %v435_v52  ;;  %v440_v52 = vpack.c.bf16 %v338_v30, %v336_v29  ;;  %v345_v55 = vld [vmem:[%s2580_s8 + $0x1c8] sm:$0xff]  ;;  %v347_v56 = vld [vmem:[%s2580_s8 + $0x1d8] sm:$0xff]  ;;  %v404_v11 = vld [vmem:[%s2580_s8 + $0x3a0] sm:$0xff] }
  0x7c   : > { %1973 = vmatprep.subr.bf16.mxu1 %v2712_v54  ;;  %v405_v63 = vld [vmem:[%s2580_s8 + $0x3a8] sm:$0xff]  ;;  %v407_v0 = vld [vmem:[%s2580_s8 + $0x3b8] sm:$0xff]  ;;  %1291 = vmatprep.mubr.bf16.mxu1 %v2204_v47  ;;  %v406_v14 = vld [vmem:[%s2580_s8 + $0x3b0] sm:$0xff] }
  0x7d   : > { %v349_v8 = vld [vmem:[%s2580_s8 + $0x1e8] sm:$0xff]  ;;  %v351_v9 = vld [vmem:[%s2580_s8 + $0x1f8] sm:$0xff]  ;;  %v2784_v13 = vpack.c.bf16 %v407_v0, %v405_v63  ;;  %v348_v18 = vld [vmem:[%s2580_s8 + $0x1e0] sm:$0xff]  ;;  %v2792_v26 = vpack.c.bf16 %v406_v14, %v404_v11 }
  0x7e   : > { %1075 = vmatpush1.bf16.msra.mxu0 %v434_v61  ;;  %v402_v61 = vld [vmem:[%s2580_s8 + $0x390] sm:$0xff]  ;;  %v409_v16 = vld [vmem:[%s2580_s8 + $0x3c8] sm:$0xff]  ;;  %v408_v27 = vld [vmem:[%s2580_s8 + $0x3c0] sm:$0xff]  ;;  %v447_v28 = vpack.c.bf16 %v351_v9, %v349_v8 }
  0x7f   : > { %1989 = vmatpush1.bf16.msra.mxu1 %v2722_v1  ;;  %1076 = vmatprep.subr.bf16.mxu0 %v437_v2  ;;  %v344_v2 = vld [vmem:[%s2580_s8 + $0x1c0] sm:$0xff]  ;;  %v2778_v6 = vpack.c.bf16 %v402_v61, %v400_v57  ;;  %v350_v23 = vld [vmem:[%s2580_s8 + $0x1f0] sm:$0xff]  ;;  %v415_v36 = vld [vmem:[%s2580_s8 + $0x3f8] sm:$0xff] }
  0x80   : > { %1974 = vmatprep.subr.bf16.mxu1 %v2726_v4  ;;  %v444_v25 = vpack.c.bf16 %v346_v3, %v344_v2  ;;  %v410_v30 = vld [vmem:[%s2580_s8 + $0x3d0] sm:$0xff]  ;;  %v446_v37 = vpack.c.bf16 %v350_v23, %v348_v18  ;;  %v412_v41 = vld [vmem:[%s2580_s8 + $0x3e0] sm:$0xff]  ;;  %v2202_v50 = vld [vmem:[#allocation4 + $0x28] ss:$16 sps:$4 sm:$0xff]  }
  0x81   : > { %v2802_v40 = vpack.c.bf16 %v410_v30, %v408_v27  ;;  %v414_v45 = vld [vmem:[%s2580_s8 + $0x3f0] sm:$0xff]  ;;  %v544_v57 = vld [vmem:[%s3252_s2] sm:$0xff]  ;;  %v2220_v2 = vld [vmem:[#allocation4 + $0x8c] ss:$16 sps:$4 sm:$0xff]  }
  0x82   : > { %1077 = vmatpush1.bf16.msra.mxu0 %v436_v12  ;;  %v445_v12 = vpack.c.bf16 %v347_v56, %v345_v55  ;;  %v2196_v46 = vld [vmem:[#allocation4] ss:$16 sps:$4 sm:$0xff]   ;;  %v2199_v47 = vld [vmem:[#allocation4 + $0x24] ss:$16 sps:$4 sm:$0xff]   ;;  %v2810_v48 = vpack.c.bf16 %v414_v45, %v412_v41  ;;  %578 = vperm.xlu0 %2194, %v544_v57   ;;  %v2226_v9 = vld [vmem:[#allocation4 + $0xac] ss:$16 sps:$4 sm:$0xff]  }
  0x83   : > { %1990 = vmatpush1.bf16.msra.mxu1 %v2736_v15  ;;  %1078 = vmatprep.subr.bf16.mxu0 %v439_v17  ;;  %v411_v17 = vld [vmem:[%s2580_s8 + $0x3d8] sm:$0xff]  ;;  %v2201_v55 = vld [vmem:[#allocation4 + $0x20] ss:$16 sps:$4 sm:$0xff]   ;;  %v2205_v56 = vld [vmem:[#allocation4 + $0x44] ss:$16 sps:$4 sm:$0xff]  }
  0x84   : > { %1975 = vmatprep.subr.bf16.mxu1 %v2740_v21  ;;  %v2796_v29 = vpack.c.bf16 %v411_v17, %v409_v16  ;;  %v2207_v61 = vld [vmem:[#allocation4 + $0x40] ss:$16 sps:$4 sm:$0xff]   ;;  %v2211_v63 = vld [vmem:[#allocation4 + $0x64] ss:$16 sps:$4 sm:$0xff]   ;;  %v2232_v16 = vld [vmem:[#allocation4 + $0xcc] ss:$16 sps:$4 sm:$0xff]  }
  0x85   : > { %v548_v0 = vld [vmem:[%s3252_s2 + $0x20] sm:$0xff]  ;;  %v550_v3 = vld [vmem:[%s3252_s2 + $0x30] sm:$0xff]  ;;  %v2250_v45 = vld [vmem:[#allocation4 + $0x12c] ss:$16 sps:$4 sm:$0xff]  }
  0x86   : > { %1079 = vmatpush1.bf16.msra.mxu0 %v438_v31  ;;  %v413_v31 = vld [vmem:[%s2580_s8 + $0x3e8] sm:$0xff]  ;;  %v552_v8 = vld [vmem:[%s3252_s2 + $0x40] sm:$0xff]  ;;  %v554_v11 = vld [vmem:[%s3252_s2 + $0x50] sm:$0xff] }
  0x87   : > { %1991 = vmatpush1.bf16.msra.mxu1 %v2750_v34  ;;  %1080 = vmatprep.subr.bf16.mxu0 %v441_v42  ;;  %v2806_v42 = vpack.c.bf16 %v415_v36, %v413_v31  ;;  %v556_v14 = vld [vmem:[%s3252_s2 + $0x60] sm:$0xff]  ;;  %v558_v17 = vld [vmem:[%s3252_s2 + $0x70] sm:$0xff]  ;;  %v2244_v31 = vld [vmem:[#allocation4 + $0x10c] ss:$16 sps:$4 sm:$0xff]  }
  0x88   : > { %1976 = vmatprep.subr.bf16.mxu1 %v2757_v43  ;;  %v2229_v18 = vld [vmem:[#allocation4 + $0xc4] ss:$16 sps:$4 sm:$0xff]  }
  0x89   : > { %v560_v23 = vld [vmem:[%s3252_s2 + $0x80] sm:$0xff]  ;;  %v562_v27 = vld [vmem:[%s3252_s2 + $0x90] sm:$0xff] }
  0x8a   : > { %1081 = vmatpush1.bf16.msra.mxu0 %v440_v52  ;;  %v2208_v52 = vld [vmem:[#allocation4 + $0x4c] ss:$16 sps:$4 sm:$0xff]   ;;  %v564_v30 = vld [vmem:[%s3252_s2 + $0xa0] sm:$0xff]  ;;  %v566_v36 = vld [vmem:[%s3252_s2 + $0xb0] sm:$0xff] }
  0x8b   : > { %1992 = vmatpush1.bf16.msra.mxu1 %v2764_v53  ;;  %1082 = vmatprep.subr.bf16.mxu0 %v443_v58  ;;  %v547_v58 = vld [vmem:[%s3252_s2 + $0x18] sm:$0xff]  ;;  %v568_v41 = vld [vmem:[%s3252_s2 + $0xc0] sm:$0xff] }
  0x8c   : > { %1977 = vmatprep.subr.bf16.mxu1 %v2770_v60  ;;  %v1670_v57 = vld [vmem:[%s3254_s4] sm:$0xff] }
  0x8e   : > { %1083 = vmatpush1.bf16.msra.mxu0 %v442_v5  ;;  %v553_v5 = vld [vmem:[%s3252_s2 + $0x48] sm:$0xff] }
  0x8f   : > { %1993 = vmatpush1.bf16.msra.mxu1 %v2778_v6  ;;  %1084 = vmatprep.subr.bf16.mxu0 %v445_v12  ;;  %v2223_v12 = vld [vmem:[#allocation4 + $0xa4] ss:$16 sps:$4 sm:$0xff]  }
  0x90   : > { %1978 = vmatprep.subr.bf16.mxu1 %v2784_v13 }
  0x92   : > { %1085 = vmatpush1.bf16.msra.mxu0 %v444_v25  ;;  %v2238_v25 = vld [vmem:[#allocation4 + $0xec] ss:$16 sps:$4 sm:$0xff]  }
  0x93   : > { %1994 = vmatpush1.bf16.msra.mxu1 %v2792_v26  ;;  %1086 = vmatprep.subr.bf16.mxu0 %v447_v28  ;;  %v2235_v28 = vld [vmem:[#allocation4 + $0xe4] ss:$16 sps:$4 sm:$0xff]  }
  0x94   : > { %1979 = vmatprep.subr.bf16.mxu1 %v2796_v29 }
  0x96   : > { %1087 = vmatpush1.bf16.msra.mxu0 %v446_v37  ;;  %v2241_v37 = vld [vmem:[#allocation4 + $0x104] ss:$16 sps:$4 sm:$0xff]  }
  0x97   : > { %1995 = vmatpush1.bf16.msra.mxu1 %v2802_v40  ;;  %1249 = vmatprep.subr.bf16.mxu0 %v2605_v20  ;;  %v546_v20 = vld [vmem:[%s3252_s2 + $0x10] sm:$0xff] }
  0x98   : > { %1980 = vmatprep.subr.bf16.mxu1 %v2806_v42  ;;  %588 = vperm.xlu1 %2195, %v546_v20   ;;  %v2253_v20 = vld [vmem:[#allocation4 + $0x144] ss:$16 sps:$4 sm:$0xff]  }
  0x99   : > { %1089 = vmatmul.mubr.bf16.vlgmr.msra.gmra.mrb[0].mxu0 %v2196_v46  ;;  %v570_v46 = vld [vmem:[%s3252_s2 + $0xd0] sm:$0xff] }
  0x9a   : > { %1098 = vmatprep.mubr.bf16.mxu0 %v2199_v47  ;;  %1250 = vmatpush1.bf16.msra.mxu0 %v2608_v22  ;;  %v2210_v22 = vld [vmem:[#allocation4 + $0x48] ss:$16 sps:$4 sm:$0xff]   ;;  %v2247_v47 = vld [vmem:[#allocation4 + $0x124] ss:$16 sps:$4 sm:$0xff]  }
  0x9b   : > { %1996 = vmatpush1.bf16.msra.mxu1 %v2810_v48  ;;  %1251 = vmatprep.subr.bf16.mxu0 %v2620_v32  ;;  %v2214_v32 = vld [vmem:[#allocation4 + $0x6c] ss:$16 sps:$4 sm:$0xff]  }
  0x9c   : > { %593 = vperm.xlu1 %2195, %v547_v58   ;;  %v2262_v58 = vld [vmem:[#allocation4 + $0x16c] ss:$16 sps:$4 sm:$0xff]  }
  0x9e   : > { %1292 = vmatmul.mubr.bf16.vlgmr.msra.gmra.mrb[0].mxu1 %v2202_v50  ;;  %1252 = vmatpush1.bf16.msra.mxu0 %v2622_v33  ;;  %v545_v33 = vld [vmem:[%s3252_s2 + $0x8] sm:$0xff]  ;;  %v572_v50 = vld [vmem:[%s3252_s2 + $0xe0] sm:$0xff] }
  0x9f   : > { %1301 = vmatprep.mubr.bf16.mxu1 %v2208_v52  ;;  %1253 = vmatprep.subr.bf16.mxu0 %v2629_v39  ;;  %v549_v39 = vld [vmem:[%s3252_s2 + $0x28] sm:$0xff] }
  0xa0   : > { %583 = vperm.xlu0 %2194, %v545_v33   ;;  %603 = vperm.xlu1 %2195, %v549_v39   ;;  %v2256_v52 = vld [vmem:[#allocation4 + $0x14c] ss:$16 sps:$4 sm:$0xff]   ;;  %v1672_v33 = vld [vmem:[%s3254_s4 + $0x10] sm:$0xff] }
  0xa1   : > { %1099 = vmatmul.mubr.bf16.gmra.mrb[4].mxu0 %v2201_v55  ;;  %v574_v55 = vld [vmem:[%s3252_s2 + $0xf0] sm:$0xff] }
  0xa2   : > { %1108 = vmatprep.mubr.bf16.mxu0 %v2205_v56  ;;  %1254 = vmatpush1.bf16.msra.mxu0 %v2635_v44  ;;  %v2216_v44 = vld [vmem:[#allocation4 + $0x68] ss:$16 sps:$4 sm:$0xff]   ;;  %v2249_v56 = vld [vmem:[#allocation4 + $0x120] ss:$16 sps:$4 sm:$0xff]   ;;  %v2259_v39 = vld [vmem:[#allocation4 + $0x164] ss:$16 sps:$4 sm:$0xff]  }
  0xa3   : > { %1255 = vmatprep.subr.bf16.mxu0 %v2641_v49  ;;  %v551_v49 = vld [vmem:[%s3252_s2 + $0x38] sm:$0xff] }
  0xa4   : > { %598 = vperm.xlu0 %2194, %v548_v0   ;;  %613 = vperm.xlu1 %2195, %v551_v49   ;;  %v2268_v0 = vld [vmem:[#allocation4 + $0x18c] ss:$16 sps:$4 sm:$0xff]   ;;  %v2265_v49 = vld [vmem:[#allocation4 + $0x184] ss:$16 sps:$4 sm:$0xff]  }
  0xa6   : > { %1302 = vmatmul.mubr.bf16.gmra.mrb[4].mxu1 %v2210_v22  ;;  %1256 = vmatpush1.bf16.msra.mxu0 %v2652_v59  ;;  %v2213_v59 = vld [vmem:[#allocation4 + $0x60] ss:$16 sps:$4 sm:$0xff]   ;;  %v2258_v22 = vld [vmem:[#allocation4 + $0x148] ss:$16 sps:$4 sm:$0xff]  }
  0xa7   : > { %1311 = vmatprep.mubr.bf16.mxu1 %v2214_v32  ;;  %1257 = vmatprep.subr.bf16.mxu0 %v2656_v62  ;;  %v2217_v62 = vld [vmem:[#allocation4 + $0x84] ss:$16 sps:$4 sm:$0xff]   ;;  %v1673_v32 = vld [vmem:[%s3254_s4 + $0x18] sm:$0x7] }
  0xa8   : > { %608 = vperm.xlu0 %2194, %v550_v3   ;;  %623 = vperm.xlu1 %2195, %v553_v5   ;;  %v2274_v3 = vld [vmem:[#allocation4 + $0x1ac] ss:$16 sps:$4 sm:$0xff]   ;;  %v2276_v5 = vld [vmem:[#allocation4 + $0x1a8] ss:$16 sps:$4 sm:$0xff]  }
  0xa9   : > { %1109 = vmatmul.mubr.bf16.gmra.mrb[8].mxu0 %v2207_v61  ;;  %v2255_v61 = vld [vmem:[#allocation4 + $0x140] ss:$16 sps:$4 sm:$0xff]  }
  0xaa   : > { %1118 = vmatprep.mubr.bf16.mxu0 %v2211_v63  ;;  %1258 = vmatpush1.bf16.msra.mxu0 %v2666_v7  ;;  %v2222_v7 = vld [vmem:[#allocation4 + $0x88] ss:$16 sps:$4 sm:$0xff]  }
  0xab   : > { %1259 = vmatprep.subr.bf16.mxu0 %v2670_v10  ;;  %v555_v10 = vld [vmem:[%s3252_s2 + $0x58] sm:$0xff] }
  0xac   : > { %618 = vperm.xlu0 %2194, %v552_v8   ;;  %633 = vperm.xlu1 %2195, %v555_v10   ;;  %v2264_v63 = vld [vmem:[#allocation4 + $0x168] ss:$16 sps:$4 sm:$0xff]   ;;  %v2280_v8 = vld [vmem:[#allocation4 + $0x1cc] ss:$16 sps:$4 sm:$0xff]   ;;  %v2277_v10 = vld [vmem:[#allocation4 + $0x1c4] ss:$16 sps:$4 sm:$0xff]  }
  0xae   : > { %1312 = vmatmul.mubr.bf16.gmra.mrb[8].mxu1 %v2216_v44  ;;  %1260 = vmatpush1.bf16.msra.mxu0 %v2680_v19  ;;  %v2219_v19 = vld [vmem:[#allocation4 + $0x80] ss:$16 sps:$4 sm:$0xff]  }
  0xaf   : > { %1321 = vmatprep.mubr.bf16.mxu1 %v2220_v2  ;;  %1261 = vmatprep.subr.bf16.mxu0 %v2684_v24  ;;  %v557_v24 = vld [vmem:[%s3252_s2 + $0x68] sm:$0xff]  ;;  %v2261_v44 = vld [vmem:[#allocation4 + $0x160] ss:$16 sps:$4 sm:$0xff]  }
  0xb0   : > { %628 = vperm.xlu0 %2194, %v554_v11   ;;  %643 = vperm.xlu1 %2195, %v557_v24   ;;  %v2270_v2 = vld [vmem:[#allocation4 + $0x188] ss:$16 sps:$4 sm:$0xff]   ;;  %v2286_v11 = vld [vmem:[#allocation4 + $0x1ec] ss:$16 sps:$4 sm:$0xff]   ;;  %v2283_v24 = vld [vmem:[#allocation4 + $0x1e4] ss:$16 sps:$4 sm:$0xff]  }
  0xb1   : > { %1119 = vmatmul.mubr.bf16.gmra.mrb[12].mxu0 %v2213_v59  ;;  %v2267_v59 = vld [vmem:[#allocation4 + $0x180] ss:$16 sps:$4 sm:$0xff]  }
  0xb2   : > { %1128 = vmatprep.mubr.bf16.mxu0 %v2217_v62  ;;  %1262 = vmatpush1.bf16.msra.mxu0 %v2694_v35  ;;  %v2228_v35 = vld [vmem:[#allocation4 + $0xa8] ss:$16 sps:$4 sm:$0xff]   ;;  %v2271_v62 = vld [vmem:[#allocation4 + $0x1a4] ss:$16 sps:$4 sm:$0xff]  }
  0xb3   : > { %1263 = vmatprep.subr.bf16.mxu0 %v2698_v38  ;;  %v559_v38 = vld [vmem:[%s3252_s2 + $0x78] sm:$0xff] }
  0xb4   : > { %638 = vperm.xlu0 %2194, %v556_v14   ;;  %653 = vperm.xlu1 %2195, %v559_v38   ;;  %v2285_v14 = vld [vmem:[#allocation4 + $0x1e0] ss:$16 sps:$4 sm:$0xff]   ;;  %v2289_v38 = vld [vmem:[#allocation4 + $0x8] ss:$16 sps:$4 sm:$0xff]  }
  0xb6   : > { %1322 = vmatmul.mubr.bf16.gmra.mrb[12].mxu1 %v2222_v7  ;;  %1264 = vmatpush1.bf16.msra.mxu0 %v2708_v51  ;;  %v2225_v51 = vld [vmem:[#allocation4 + $0xa0] ss:$16 sps:$4 sm:$0xff]  }
  0xb7   : > { %1331 = vmatprep.mubr.bf16.mxu1 %v2226_v9  ;;  %1265 = vmatprep.subr.bf16.mxu0 %v2712_v54  ;;  %v561_v54 = vld [vmem:[%s3252_s2 + $0x88] sm:$0xff]  ;;  %v2273_v7 = vld [vmem:[#allocation4 + $0x1a0] ss:$16 sps:$4 sm:$0xff]  }
  0xb8   : > { %648 = vperm.xlu0 %2194, %v558_v17   ;;  %663 = vperm.xlu1 %2195, %v561_v54   ;;  %v2282_v9 = vld [vmem:[#allocation4 + $0x1c8] ss:$16 sps:$4 sm:$0xff]  }
  0xb9   : > { %1129 = vmatmul.mubr.bf16.gmra.mrb[16].mxu0 %v2219_v19  ;;  %v2279_v19 = vld [vmem:[#allocation4 + $0x1c0] ss:$16 sps:$4 sm:$0xff]  }
  0xba   : > { %1138 = vmatprep.mubr.bf16.mxu0 %v2223_v12  ;;  %1266 = vmatpush1.bf16.msra.mxu0 %v2722_v1  ;;  %v2234_v1 = vld [vmem:[#allocation4 + $0xc8] ss:$16 sps:$4 sm:$0xff]  }
  0xbb   : > { %1267 = vmatprep.subr.bf16.mxu0 %v2726_v4  ;;  %v563_v4 = vld [vmem:[%s3252_s2 + $0x98] sm:$0xff] }
  0xbc   : > { %658 = vperm.xlu0 %2194, %v560_v23   ;;  %673 = vperm.xlu1 %2195, %v563_v4   ;;  %v2288_v12 = vld [vmem:[#allocation4 + $0x1e8] ss:$16 sps:$4 sm:$0xff]  }
  0xbe   : > { %1332 = vmatmul.mubr.bf16.gmra.mrb[16].mxu1 %v2228_v35  ;;  %1268 = vmatpush1.bf16.msra.mxu0 %v2736_v15  ;;  %v2231_v15 = vld [vmem:[#allocation4 + $0xc0] ss:$16 sps:$4 sm:$0xff]   ;;  %v2291_v35 = vld [vmem:[#allocation4 + $0xc] ss:$16 sps:$4 sm:$0xff]  }
  0xbf   : > { %1341 = vmatprep.mubr.bf16.mxu1 %v2232_v16  ;;  %1269 = vmatprep.subr.bf16.mxu0 %v2740_v21  ;;  %v565_v21 = vld [vmem:[%s3252_s2 + $0xa8] sm:$0xff] }
  0xc0   : > { %668 = vperm.xlu0 %2194, %v562_v27   ;;  %683 = vperm.xlu1 %2195, %v565_v21  }
  0xc1   : > { %1139 = vmatmul.mubr.bf16.gmra.mrb[20].mxu0 %v2225_v51 }
  0xc2   : > { %1148 = vmatprep.mubr.bf16.mxu0 %v2229_v18  ;;  %1270 = vmatpush1.bf16.msra.mxu0 %v2750_v34  ;;  %v2240_v34 = vld [vmem:[#allocation4 + $0xe8] ss:$16 sps:$4 sm:$0xff]  }
  0xc3   : > { %1271 = vmatprep.subr.bf16.mxu0 %v2757_v43  ;;  %v567_v43 = vld [vmem:[%s3252_s2 + $0xb8] sm:$0xff] }
  0xc4   : > { %678 = vperm.xlu0 %2194, %v564_v30   ;;  %693 = vperm.xlu1 %2195, %v567_v43  }
  0xc6   : > { %1342 = vmatmul.mubr.bf16.gmra.mrb[20].mxu1 %v2234_v1  ;;  %1272 = vmatpush1.bf16.msra.mxu0 %v2764_v53  ;;  %v2237_v53 = vld [vmem:[#allocation4 + $0xe0] ss:$16 sps:$4 sm:$0xff]  }
  0xc7   : > { %1351 = vmatprep.mubr.bf16.mxu1 %v2238_v25  ;;  %1273 = vmatprep.subr.bf16.mxu0 %v2770_v60  ;;  %v569_v60 = vld [vmem:[%s3252_s2 + $0xc8] sm:$0xff] }
  0xc8   : > { %688 = vperm.xlu0 %2194, %v566_v36   ;;  %703 = vperm.xlu1 %2195, %v569_v60  }
  0xc9   : > { %1149 = vmatmul.mubr.bf16.gmra.mrb[24].mxu0 %v2231_v15 }
  0xca   : > { %1158 = vmatprep.mubr.bf16.mxu0 %v2235_v28  ;;  %1274 = vmatpush1.bf16.msra.mxu0 %v2778_v6  ;;  %v2246_v6 = vld [vmem:[#allocation4 + $0x108] ss:$16 sps:$4 sm:$0xff]  }
  0xcb   : > { %1275 = vmatprep.subr.bf16.mxu0 %v2784_v13  ;;  %v571_v13 = vld [vmem:[%s3252_s2 + $0xd8] sm:$0xff] }
  0xcc   : > { %698 = vperm.xlu0 %2194, %v568_v41   ;;  %713 = vperm.xlu1 %2195, %v571_v13  }
  0xce   : > { %1352 = vmatmul.mubr.bf16.gmra.mrb[24].mxu1 %v2240_v34  ;;  %1276 = vmatpush1.bf16.msra.mxu0 %v2792_v26  ;;  %v2243_v26 = vld [vmem:[#allocation4 + $0x100] ss:$16 sps:$4 sm:$0xff]  }
  0xcf   : > { %1361 = vmatprep.mubr.bf16.mxu1 %v2244_v31  ;;  %1277 = vmatprep.subr.bf16.mxu0 %v2796_v29  ;;  %v573_v29 = vld [vmem:[%s3252_s2 + $0xe8] sm:$0xff] }
  0xd0   : > { %708 = vperm.xlu0 %2194, %v570_v46   ;;  %723 = vperm.xlu1 %2195, %v573_v29  }
  0xd1   : > { %1159 = vmatmul.mubr.bf16.gmra.mrb[28].mxu0 %v2237_v53 }
  0xd2   : > { %1168 = vmatprep.mubr.bf16.mxu0 %v2241_v37  ;;  %1278 = vmatpush1.bf16.msra.mxu0 %v2802_v40  ;;  %v2252_v40 = vld [vmem:[#allocation4 + $0x128] ss:$16 sps:$4 sm:$0xff]  }
  0xd3   : > { %1279 = vmatprep.subr.bf16.mxu0 %v2806_v42  ;;  %v575_v42 = vld [vmem:[%s3252_s2 + $0xf8] sm:$0xff] }
  0xd4   : > { %718 = vperm.xlu0 %2194, %v572_v50   ;;  %733 = vperm.xlu1 %2195, %v575_v42  }
  0xd6   : > { %1362 = vmatmul.mubr.bf16.gmra.mrb[28].mxu1 %v2246_v6  ;;  %1280 = vmatpush1.bf16.msra.mxu0 %v2810_v48  ;;  %v1671_v48 = vld [vmem:[%s3254_s4 + $0x8] sm:$0xff] }
  0xd7   : > { %1371 = vmatprep.mubr.bf16.mxu1 %v2250_v45 }
  0xd8   : > { %728 = vperm.xlu0 %2194, %v574_v55   ;;  %1681 = vperm.xlu1 %2195, %v1671_v48  }
  0xd9   : > { %1169 = vmatmul.mubr.bf16.gmra.mrb[32].mxu0 %v2243_v26 }
  0xda   : > { %1178 = vmatprep.mubr.bf16.mxu0 %v2247_v47 }
  0xdc   : > { %1676 = vperm.xlu0 %2194, %v1670_v57   ;;  %1691 = vperm.xlu1 %2195, %v1673_v32  }
  0xde   : > { %1372 = vmatmul.mubr.bf16.gmra.mrb[32].mxu1 %v2252_v40 }
  0xdf   : > { %1381 = vmatprep.mubr.bf16.mxu1 %v2256_v52 }
  0xe0   : > { %1686 = vperm.xlu0 %2194, %v1672_v33  }
  0xe1   : > { %1179 = vmatmul.mubr.bf16.gmra.mrb[36].mxu0 %v2249_v56 }
  0xe2   : > { %1188 = vmatprep.mubr.bf16.mxu0 %v2253_v20 }
  0xe6   : > { %1382 = vmatmul.mubr.bf16.gmra.mrb[36].mxu1 %v2258_v22 }
  0xe7   : > { %1391 = vmatprep.mubr.bf16.mxu1 %v2262_v58 }
  0xe9   : > { %1189 = vmatmul.mubr.bf16.gmra.mrb[40].mxu0 %v2255_v61 }
  0xea   : > { %1198 = vmatprep.mubr.bf16.mxu0 %v2259_v39 }
  0xee   : > { %1392 = vmatmul.mubr.bf16.gmra.mrb[40].mxu1 %v2264_v63 }
  0xef   : > { %1401 = vmatprep.mubr.bf16.mxu1 %v2268_v0 }
  0xf1   : > { %1199 = vmatmul.mubr.bf16.gmra.mrb[44].mxu0 %v2261_v44 }
  0xf2   : > { %1208 = vmatprep.mubr.bf16.mxu0 %v2265_v49 }
  0xf6   : > { %1402 = vmatmul.mubr.bf16.gmra.mrb[44].mxu1 %v2270_v2 }
  0xf7   : > { %1411 = vmatprep.mubr.bf16.mxu1 %v2274_v3 }
  0xf9   : > { %1209 = vmatmul.mubr.bf16.gmra.mrb[48].mxu0 %v2267_v59 }
  0xfa   : > { %1218 = vmatprep.mubr.bf16.mxu0 %v2271_v62 }
  0xfe   : > { %1412 = vmatmul.mubr.bf16.gmra.mrb[48].mxu1 %v2276_v5 }
  0xff   : > { %1421 = vmatprep.mubr.bf16.mxu1 %v2280_v8 }
 0x101   : > { %1219 = vmatmul.mubr.bf16.gmra.mrb[52].mxu0 %v2273_v7  ;;  %v2954_v17 = vpop.permute.xlu0 %578 }
 0x102   : > { %1228 = vmatprep.mubr.bf16.mxu0 %v2277_v10 }
 0x106   : > { %1422 = vmatmul.mubr.bf16.gmra.mrb[52].mxu1 %v2282_v9 }
 0x107   : > { %1431 = vmatprep.mubr.bf16.mxu1 %v2286_v11 }
 0x109   : > { %1229 = vmatmul.mubr.bf16.gmra.mrb[56].mxu0 %v2279_v19 }
 0x10a   : > { %1238 = vmatprep.mubr.bf16.mxu0 %v2283_v24 }
 0x10e   : > { %1432 = vmatmul.mubr.bf16.gmra.mrb[56].mxu1 %v2288_v12 }
 0x111   : > { %1239 = vmatmul.mubr.bf16.gmra.mrb[60].mxu0 %v2285_v14 }
 0x112   : > { %1281 = vmatprep.mubr.bf16.mxu0 %v2291_v35 }
 0x117   : > { %v589_v16 = vpop.permute.xlu1 %588 }
 0x119   : > { %1282 = vmatmul.mubr.bf16.vlgmr.msra.gmra.mrb[0].mxu0 %v2289_v38 }
 0x11b   : > { %v594_v23 = vpop.permute.xlu1 %593 }
 0x11f   : > { %v2956_v25 = vpop.permute.xlu0 %583  ;;  %v604_v40 = vpop.permute.xlu1 %603 }
 0x123   : > { %v599_v45 = vpop.permute.xlu0 %598  ;;  %v614_v19 = vpop.permute.xlu1 %613 }
 0x127   : > { %v609_v5 = vpop.permute.xlu0 %608 }
 0x171   : > { %v1293_v51 = vpop.f32.mrb[0].mxu1 }
 0x172   : > { %v1295_v54 = vpop.f32.mrb[1].mxu1 }
 0x173   : > { %v1297_v18 = vpop.f32.mrb[2].mxu1 }
 0x174   : > { %v1299_v1 = vpop.f32.mrb[3].mxu1  ;;  %v1100_v4 = vpop.f32.mrb[4].mxu0 }
 0x175   : > { %v1101_v27 = vadd.f32 %v1100_v4, %v589_v16  ;;  %v1102_v15 = vpop.f32.mrb[5].mxu0 }
 0x176   : > { %v1103_v21 = vadd.f32 %v1102_v15, %v589_v16  ;;  %v1104_v28 = vpop.f32.mrb[6].mxu0 }
 0x177   : > { %v1105_v30 = vadd.f32 %v1104_v28, %v594_v23  ;;  %v1294_v34 = vadd.f32 %v1293_v51, %v1101_v27  ;;  %v1106_v43 = vpop.f32.mrb[7].mxu0 }
 0x178   : > { %v1107_v31 = vadd.f32 %v1106_v43, %v594_v23  ;;  %v1296_v36 = vadd.f32 %v1295_v54, %v1103_v21 }
 0x179   : > { %v1303_v53 = vpop.f32.mrb[4].mxu1  ;;  %v1510_v60 = vmul.f32 0.1, %v1294_v34  ;;  %v1298_v37 = vadd.f32 %v1297_v18, %v1105_v30  ;;  %vm1446_vm0 = vcmp.gt.f32.partialorder %v1294_v34, 0.0 }
 0x17a   : > { %v1305_v41 = vpop.f32.mrb[5].mxu1  ;;  %v1511_v6 = vmul.f32 0.1, %v1296_v36  ;;  %v1300_v13 = vadd.f32 %v1299_v1, %v1107_v31  ;;  %vm1447_vm1 = vcmp.gt.f32.partialorder %v1296_v36, 0.0 }
 0x17b   : > { %v1307_v46 = vpop.f32.mrb[6].mxu1  ;;  %vm1448_vm2 = vcmp.gt.f32.partialorder %v1298_v37, 0.0  ;;  %v1512_v26 = vmul.f32 0.1, %v1298_v37  ;;  %v2958_v42 = vsel %vm1446_vm0, %v1294_v34, %v1510_v60 }
 0x17c   : > { %v1309_v29 = vpop.f32.mrb[7].mxu1  ;;  %vm1449_vm3 = vcmp.gt.f32.partialorder %v1300_v13, 0.0  ;;  %v1513_v47 = vmul.f32 0.1, %v1300_v13  ;;  %v1110_v50 = vpop.f32.mrb[8].mxu0  ;;  %v2964_v22 = vsel %vm1447_vm1, %v1296_v36, %v1511_v6 }
 0x17d   : > { %v2960_v52 = vsel %vm1448_vm2, %v1298_v37, %v1512_v26  ;;  %v1111_v55 = vadd.f32 %v1110_v50, %v599_v45  ;;  %v1112_v56 = vpop.f32.mrb[9].mxu0 }
 0x17e   : > { %v1113_v20 = vadd.f32 %v1112_v56, %v599_v45  ;;  %v1114_v57 = vpop.f32.mrb[10].mxu0  ;;  %v2966_v32 = vsel %vm1449_vm3, %v1300_v13, %v1513_v47  ;;  %v624_v45 = vpop.permute.xlu1 %623 }
 0x17f   : > { %v1115_v58 = vadd.f32 %v1114_v57, %v604_v40  ;;  %v1304_v33 = vadd.f32 %v1303_v53, %v1111_v55  ;;  %v1116_v61 = vpop.f32.mrb[11].mxu0  ;;  %v619_v53 = vpop.permute.xlu0 %618 }
 0x180   : > { %v1117_v63 = vadd.f32 %v1116_v61, %v604_v40  ;;  %v1306_v0 = vadd.f32 %v1305_v41, %v1113_v20 }
 0x181   : > { %v1313_v44 = vpop.f32.mrb[8].mxu1  ;;  %v1514_v49 = vmul.f32 0.1, %v1304_v33  ;;  %v1308_v2 = vadd.f32 %v1307_v46, %v1115_v58  ;;  %vm1450_vm4 = vcmp.gt.f32.partialorder %v1304_v33, 0.0 }
 0x182   : > { %v1315_v3 = vpop.f32.mrb[9].mxu1  ;;  %v1515_v59 = vmul.f32 0.1, %v1306_v0  ;;  %v1310_v62 = vadd.f32 %v1309_v29, %v1117_v63  ;;  %vm1451_vm5 = vcmp.gt.f32.partialorder %v1306_v0, 0.0 }
 0x183   : > { %v1317_v8 = vpop.f32.mrb[10].mxu1  ;;  %vm1452_vm6 = vcmp.gt.f32.partialorder %v1308_v2, 0.0  ;;  %v1516_v7 = vmul.f32 0.1, %v1308_v2  ;;  %v2970_v24 = vsel %vm1450_vm4, %v1304_v33, %v1514_v49 }
 0x184   : > { %v1319_v10 = vpop.f32.mrb[11].mxu1  ;;  %vm1453_vm7 = vcmp.gt.f32.partialorder %v1310_v62, 0.0  ;;  %v1517_v9 = vmul.f32 0.1, %v1310_v62  ;;  %v1120_v11 = vpop.f32.mrb[12].mxu0  ;;  %v2976_v54 = vsel %vm1451_vm5, %v1306_v0, %v1515_v59 }
 0x185   : > { %v2972_v12 = vsel %vm1452_vm6, %v1308_v2, %v1516_v7  ;;  %v1121_v14 = vadd.f32 %v1120_v11, %v609_v5  ;;  %v1122_v35 = vpop.f32.mrb[13].mxu0 }
 0x186   : > { %v1123_v16 = vadd.f32 %v1122_v35, %v609_v5  ;;  %v1124_v51 = vpop.f32.mrb[14].mxu0  ;;  %v2978_v18 = vsel %vm1453_vm7, %v1310_v62, %v1517_v9  ;;  %v629_v5 = vpop.permute.xlu0 %628 }
 0x187   : > { %v1125_v23 = vadd.f32 %v1124_v51, %v614_v19  ;;  %v1314_v1 = vadd.f32 %v1313_v44, %v1121_v14  ;;  %v1126_v4 = vpop.f32.mrb[15].mxu0 }
 0x188   : > { %v1127_v15 = vadd.f32 %v1126_v4, %v614_v19  ;;  %v1316_v21 = vadd.f32 %v1315_v3, %v1123_v16  ;;  %v634_v19 = vpop.permute.xlu1 %633 }
 0x189   : > { %v1323_v28 = vpop.f32.mrb[12].mxu1  ;;  %v1518_v30 = vmul.f32 0.1, %v1314_v1  ;;  %v1318_v34 = vadd.f32 %v1317_v8, %v1125_v23  ;;  %vm1454_vm8 = vcmp.gt.f32.partialorder %v1314_v1, 0.0 }
 0x18a   : > { %v1325_v43 = vpop.f32.mrb[13].mxu1  ;;  %v1519_v31 = vmul.f32 0.1, %v1316_v21  ;;  %v1320_v36 = vadd.f32 %v1319_v10, %v1127_v15  ;;  %vm1455_vm9 = vcmp.gt.f32.partialorder %v1316_v21, 0.0 }
 0x18b   : > { %v1327_v60 = vpop.f32.mrb[14].mxu1  ;;  %vm1456_vm10 = vcmp.gt.f32.partialorder %v1318_v34, 0.0  ;;  %v1520_v37 = vmul.f32 0.1, %v1318_v34  ;;  %v2982_v46 = vsel %vm1454_vm8, %v1314_v1, %v1518_v30 }
 0x18c   : > { %v1329_v41 = vpop.f32.mrb[15].mxu1  ;;  %vm1457_vm11 = vcmp.gt.f32.partialorder %v1320_v36, 0.0  ;;  %v1521_v6 = vmul.f32 0.1, %v1320_v36  ;;  %v1130_v13 = vpop.f32.mrb[16].mxu0  ;;  %v2988_v56 = vsel %vm1455_vm9, %v1316_v21, %v1519_v31 }
 0x18d   : > { %v2984_v26 = vsel %vm1456_vm10, %v1318_v34, %v1520_v37  ;;  %v1131_v29 = vadd.f32 %v1130_v13, %v619_v53  ;;  %v1132_v47 = vpop.f32.mrb[17].mxu0 }
 0x18e   : > { %v1133_v40 = vadd.f32 %v1132_v47, %v619_v53  ;;  %v1134_v55 = vpop.f32.mrb[18].mxu0  ;;  %v2990_v20 = vsel %vm1457_vm11, %v1320_v36, %v1521_v6 }
 0x18f   : > { %v1135_v57 = vadd.f32 %v1134_v55, %v624_v45  ;;  %v1324_v58 = vadd.f32 %v1323_v28, %v1131_v29  ;;  %v1136_v33 = vpop.f32.mrb[19].mxu0 }
 0x190   : > { %v1137_v63 = vadd.f32 %v1136_v33, %v624_v45  ;;  %v1326_v0 = vadd.f32 %v1325_v43, %v1133_v40  ;;  %v639_v45 = vpop.permute.xlu0 %638 }
 0x191   : > { %v1333_v44 = vpop.f32.mrb[16].mxu1  ;;  %v1522_v49 = vmul.f32 0.1, %v1324_v58  ;;  %v1328_v2 = vadd.f32 %v1327_v60, %v1135_v57  ;;  %vm1458_vm12 = vcmp.gt.f32.partialorder %v1324_v58, 0.0 }
 0x192   : > { %v1335_v3 = vpop.f32.mrb[17].mxu1  ;;  %v1523_v59 = vmul.f32 0.1, %v1326_v0  ;;  %v1330_v62 = vadd.f32 %v1329_v41, %v1137_v63  ;;  %vm1459_vm13 = vcmp.gt.f32.partialorder %v1326_v0, 0.0 }
 0x193   : > { %v1337_v8 = vpop.f32.mrb[18].mxu1  ;;  %vm1460_vm14 = vcmp.gt.f32.partialorder %v1328_v2, 0.0  ;;  %v1524_v7 = vmul.f32 0.1, %v1328_v2  ;;  %v2994_v14 = vsel %vm1458_vm12, %v1324_v58, %v1522_v49  ;;  %v644_v58 = vpop.permute.xlu1 %643 }
 0x194   : > { %v1339_v10 = vpop.f32.mrb[19].mxu1  ;;  %vm1461_vm15 = vcmp.gt.f32.partialorder %v1330_v62, 0.0  ;;  %v1525_v9 = vmul.f32 0.1, %v1330_v62  ;;  %v1140_v11 = vpop.f32.mrb[20].mxu0  ;;  %v3000_v15 = vsel %vm1459_vm13, %v1326_v0, %v1523_v59 }
 0x195   : > { %v2996_v35 = vsel %vm1460_vm14, %v1328_v2, %v1524_v7  ;;  %v1141_v16 = vadd.f32 %v1140_v11, %v629_v5  ;;  %v1142_v51 = vpop.f32.mrb[21].mxu0 }
 0x196   : > { %v1143_v1 = vadd.f32 %v1142_v51, %v629_v5  ;;  %v1144_v4 = vpop.f32.mrb[22].mxu0  ;;  %v3002_v21 = vsel %vm1461_vm15, %v1330_v62, %v1525_v9 }
 0x197   : > { %v1145_v28 = vadd.f32 %v1144_v4, %v634_v19  ;;  %v1334_v30 = vadd.f32 %v1333_v44, %v1141_v16  ;;  %v1146_v34 = vpop.f32.mrb[23].mxu0 }
 0x198   : > { %v1147_v31 = vadd.f32 %v1146_v34, %v634_v19  ;;  %v1336_v36 = vadd.f32 %v1335_v3, %v1143_v1 }
 0x199   : > { %v1343_v53 = vpop.f32.mrb[20].mxu1  ;;  %v1526_v60 = vmul.f32 0.1, %v1334_v30  ;;  %v1338_v37 = vadd.f32 %v1337_v8, %v1145_v28  ;;  %vm1462_vm0 = vcmp.gt.f32.partialorder %v1334_v30, 0.0 }
 0x19a   : > { %v1345_v41 = vpop.f32.mrb[21].mxu1  ;;  %v1527_v6 = vmul.f32 0.1, %v1336_v36  ;;  %v1340_v13 = vadd.f32 %v1339_v10, %v1147_v31  ;;  %vm1463_vm1 = vcmp.gt.f32.partialorder %v1336_v36, 0.0 }
 0x19b   : > { %v1347_v29 = vpop.f32.mrb[22].mxu1  ;;  %vm1464_vm2 = vcmp.gt.f32.partialorder %v1338_v37, 0.0  ;;  %v1528_v47 = vmul.f32 0.1, %v1338_v37  ;;  %v3006_v33 = vsel %vm1462_vm0, %v1334_v30, %v1526_v60  ;;  %v649_v30 = vpop.permute.xlu0 %648 }
 0x19c   : > { %v1349_v40 = vpop.f32.mrb[23].mxu1  ;;  %vm1465_vm3 = vcmp.gt.f32.partialorder %v1340_v13, 0.0  ;;  %v1529_v55 = vmul.f32 0.1, %v1340_v13  ;;  %v1150_v57 = vpop.f32.mrb[24].mxu0  ;;  %v3012_v59 = vsel %vm1463_vm1, %v1336_v36, %v1527_v6 }
 0x19d   : > { %v3008_v63 = vsel %vm1464_vm2, %v1338_v37, %v1528_v47  ;;  %v1151_v0 = vadd.f32 %v1150_v57, %v639_v45  ;;  %v1152_v44 = vpop.f32.mrb[25].mxu0  ;;  %v654_v37 = vpop.permute.xlu1 %653 }
 0x19e   : > { %v1153_v2 = vadd.f32 %v1152_v44, %v639_v45  ;;  %v1154_v3 = vpop.f32.mrb[26].mxu0  ;;  %v3014_v62 = vsel %vm1465_vm3, %v1340_v13, %v1529_v55 }
 0x19f   : > { %v1155_v5 = vadd.f32 %v1154_v3, %v644_v58  ;;  %v1344_v8 = vadd.f32 %v1343_v53, %v1151_v0  ;;  %v1156_v7 = vpop.f32.mrb[27].mxu0 }
 0x1a0   : > { %v1157_v9 = vadd.f32 %v1156_v7, %v644_v58  ;;  %v1346_v11 = vadd.f32 %v1345_v41, %v1153_v2 }
 0x1a1   : > { %v1353_v19 = vpop.f32.mrb[24].mxu1  ;;  %v1530_v16 = vmul.f32 0.1, %v1344_v8  ;;  %v1348_v51 = vadd.f32 %v1347_v29, %v1155_v5  ;;  %vm1466_vm4 = vcmp.gt.f32.partialorder %v1344_v8, 0.0 }
 0x1a2   : > { %v1355_v1 = vpop.f32.mrb[25].mxu1  ;;  %v1531_v4 = vmul.f32 0.1, %v1346_v11  ;;  %v1350_v28 = vadd.f32 %v1349_v40, %v1157_v9  ;;  %vm1467_vm5 = vcmp.gt.f32.partialorder %v1346_v11, 0.0 }
 0x1a3   : > { %v1357_v34 = vpop.f32.mrb[26].mxu1  ;;  %vm1468_vm6 = vcmp.gt.f32.partialorder %v1348_v51, 0.0  ;;  %v1532_v31 = vmul.f32 0.1, %v1348_v51  ;;  %v3018_v6 = vsel %vm1466_vm4, %v1344_v8, %v1530_v16 }
 0x1a4   : > { %v1359_v36 = vpop.f32.mrb[27].mxu1  ;;  %vm1469_vm7 = vcmp.gt.f32.partialorder %v1350_v28, 0.0  ;;  %v1533_v53 = vmul.f32 0.1, %v1350_v28  ;;  %v1160_v60 = vpop.f32.mrb[28].mxu0  ;;  %v3024_v55 = vsel %vm1467_vm5, %v1346_v11, %v1531_v4 }
 0x1a5   : > { %v3020_v41 = vsel %vm1468_vm6, %v1348_v51, %v1532_v31  ;;  %v1161_v13 = vadd.f32 %v1160_v60, %v649_v30  ;;  %v1162_v45 = vpop.f32.mrb[29].mxu0  ;;  %v659_v31 = vpop.permute.xlu0 %658 }
 0x1a6   : > { %v1163_v47 = vadd.f32 %v1162_v45, %v649_v30  ;;  %v1164_v40 = vpop.f32.mrb[30].mxu0  ;;  %v3026_v57 = vsel %vm1469_vm7, %v1350_v28, %v1533_v53  ;;  %v664_v60 = vpop.permute.xlu1 %663 }
 0x1a7   : > { %v1165_v58 = vadd.f32 %v1164_v40, %v654_v37  ;;  %v1354_v0 = vadd.f32 %v1353_v19, %v1161_v13  ;;  %v1166_v44 = vpop.f32.mrb[31].mxu0 }
 0x1a8   : > { %v1167_v3 = vadd.f32 %v1166_v44, %v654_v37  ;;  %v1356_v5 = vadd.f32 %v1355_v1, %v1163_v47 }
 0x1a9   : > { %v1363_v8 = vpop.f32.mrb[28].mxu1  ;;  %v1534_v7 = vmul.f32 0.1, %v1354_v0  ;;  %v1358_v9 = vadd.f32 %v1357_v34, %v1165_v58  ;;  %vm1470_vm8 = vcmp.gt.f32.partialorder %v1354_v0, 0.0 }
 0x1aa   : > { %v1365_v16 = vpop.f32.mrb[29].mxu1  ;;  %v1535_v51 = vmul.f32 0.1, %v1356_v5  ;;  %v1360_v30 = vadd.f32 %v1359_v36, %v1167_v3  ;;  %vm1471_vm9 = vcmp.gt.f32.partialorder %v1356_v5, 0.0 }
 0x1ab   : > { %v1367_v11 = vpop.f32.mrb[30].mxu1  ;;  %vm1472_vm10 = vcmp.gt.f32.partialorder %v1358_v9, 0.0  ;;  %v1536_v4 = vmul.f32 0.1, %v1358_v9  ;;  %v3030_v13 = vsel %vm1470_vm8, %v1354_v0, %v1534_v7 }
 0x1ac   : > { %v1369_v28 = vpop.f32.mrb[31].mxu1  ;;  %vm1473_vm11 = vcmp.gt.f32.partialorder %v1360_v30, 0.0  ;;  %v1537_v19 = vmul.f32 0.1, %v1360_v30  ;;  %v1170_v53 = vpop.f32.mrb[32].mxu0  ;;  %v3036_v40 = vsel %vm1471_vm9, %v1356_v5, %v1535_v51 }
 0x1ad   : > { %v3032_v1 = vsel %vm1472_vm10, %v1358_v9, %v1536_v4  ;;  %v1171_v37 = vadd.f32 %v1170_v53, %v659_v31  ;;  %v1172_v34 = vpop.f32.mrb[33].mxu0 }
 0x1ae   : > { %v1173_v36 = vadd.f32 %v1172_v34, %v659_v31  ;;  %v1174_v47 = vpop.f32.mrb[34].mxu0  ;;  %v3038_v58 = vsel %vm1473_vm11, %v1360_v30, %v1537_v19  ;;  %v669_v34 = vpop.permute.xlu0 %668 }
 0x1af   : > { %v1175_v44 = vadd.f32 %v1174_v47, %v664_v60  ;;  %v1364_v3 = vadd.f32 %v1363_v8, %v1171_v37  ;;  %v1176_v29 = vpop.f32.mrb[35].mxu0  ;;  %v674_v37 = vpop.permute.xlu1 %673 }
 0x1b0   : > { %v1177_v7 = vadd.f32 %v1176_v29, %v664_v60  ;;  %v1366_v9 = vadd.f32 %v1365_v16, %v1173_v36 }
 0x1b1   : > { %v1373_v4 = vpop.f32.mrb[32].mxu1  ;;  %v1538_v53 = vmul.f32 0.1, %v1364_v3  ;;  %v1368_v2 = vadd.f32 %v1367_v11, %v1175_v44  ;;  %vm1474_vm12 = vcmp.gt.f32.partialorder %v1364_v3, 0.0 }
 0x1b2   : > { %v1375_v49 = vpop.f32.mrb[33].mxu1  ;;  %v1539_v45 = vmul.f32 0.1, %v1366_v9  ;;  %v1370_v31 = vadd.f32 %v1369_v28, %v1177_v7  ;;  %vm1475_vm13 = vcmp.gt.f32.partialorder %v1366_v9, 0.0  ;;  %v2294_v28 = vld [vmem:[%s3253_s3 + $0x4] ss:$8 sps:$4 sm:$0xff]  }
 0x1b3   : > { %v1377_v5 = vpop.f32.mrb[34].mxu1  ;;  %vm1476_vm14 = vcmp.gt.f32.partialorder %v1368_v2, 0.0  ;;  %v1540_v51 = vmul.f32 0.1, %v1368_v2  ;;  %v3042_v47 = vsel %vm1474_vm12, %v1364_v3, %v1538_v53  ;;  %1746 = vmatprep.mubr.bf16.mxu1 %v2294_v28 }
 0x1b4   : > { %v1379_v30 = vpop.f32.mrb[35].mxu1  ;;  %vm1477_vm15 = vcmp.gt.f32.partialorder %v1370_v31, 0.0  ;;  %v1541_v8 = vmul.f32 0.1, %v1370_v31  ;;  %v1180_v19 = vpop.f32.mrb[36].mxu0  ;;  %v3052_v7 = vsel %vm1475_vm13, %v1366_v9, %v1539_v45 }
 0x1b5   : > { %v3044_v29 = vsel %vm1476_vm14, %v1368_v2, %v1540_v51  ;;  %v1181_v16 = vadd.f32 %v1180_v19, %v669_v34  ;;  %v1182_v11 = vpop.f32.mrb[37].mxu0  ;;  %v679_v45 = vpop.permute.xlu0 %678 }
 0x1b6   : > { %v1183_v36 = vadd.f32 %v1182_v11, %v669_v34  ;;  %v1184_v44 = vpop.f32.mrb[38].mxu0  ;;  %v3054_v0 = vsel %vm1477_vm15, %v1370_v31, %v1541_v8 }
 0x1b7   : > { %v1185_v3 = vadd.f32 %v1184_v44, %v674_v37  ;;  %v1374_v53 = vadd.f32 %v1373_v4, %v1181_v16  ;;  %v1186_v2 = vpop.f32.mrb[39].mxu0  ;;  %v684_v44 = vpop.permute.xlu1 %683 }
 0x1b8   : > { %v1187_v19 = vadd.f32 %v1186_v2, %v674_v37  ;;  %v1376_v10 = vadd.f32 %v1375_v49, %v1183_v36 }
 0x1b9   : > { %v1383_v23 = vpop.f32.mrb[36].mxu1  ;;  %v1542_v43 = vmul.f32 0.1, %v1374_v53  ;;  %v1378_v50 = vadd.f32 %v1377_v5, %v1185_v3  ;;  %vm1478_vm0 = vcmp.gt.f32.partialorder %v1374_v53, 0.0 }
 0x1ba   : > { %v1385_v60 = vpop.f32.mrb[37].mxu1  ;;  %v1543_v34 = vmul.f32 0.1, %v1376_v10  ;;  %v1380_v11 = vadd.f32 %v1379_v30, %v1187_v19  ;;  %vm1479_vm1 = vcmp.gt.f32.partialorder %v1376_v10, 0.0 }
 0x1bb   : > { %v1387_v9 = vpop.f32.mrb[38].mxu1  ;;  %vm1480_vm2 = vcmp.gt.f32.partialorder %v1378_v50, 0.0  ;;  %v1544_v31 = vmul.f32 0.1, %v1378_v50  ;;  %v3058_v28 = vsel %vm1478_vm0, %v1374_v53, %v1542_v43 }
 0x1bc   : > { %v1389_v4 = vpop.f32.mrb[39].mxu1  ;;  %vm1481_vm3 = vcmp.gt.f32.partialorder %v1380_v11, 0.0  ;;  %v1545_v8 = vmul.f32 0.1, %v1380_v11  ;;  %v1190_v16 = vpop.f32.mrb[40].mxu0  ;;  %3287 = vst [vmem:[#allocation8_spill] sm:$0xff] %v3058_v28  ;;  %v3064_v2 = vsel %vm1479_vm1, %v1376_v10, %v1543_v34 }
 0x1bd   : > { %v3060_v49 = vsel %vm1480_vm2, %v1378_v50, %v1544_v31  ;;  %v1191_v37 = vadd.f32 %v1190_v16, %v679_v45  ;;  %v1192_v5 = vpop.f32.mrb[41].mxu0  ;;  %3289 = vst [vmem:[#allocation10_spill] sm:$0xff] %v3064_v2 }
 0x1be   : > { %3288 = vst [vmem:[#allocation9_spill] sm:$0xff] %v3060_v49  ;;  %v1193_v30 = vadd.f32 %v1192_v5, %v679_v45  ;;  %v1194_v3 = vpop.f32.mrb[42].mxu0  ;;  %v3066_v19 = vsel %vm1481_vm3, %v1380_v11, %v1545_v8  ;;  %v689_v5 = vpop.permute.xlu0 %688 }
 0x1bf   : > { %v1195_v51 = vadd.f32 %v1194_v3, %v684_v44  ;;  %v1384_v61 = vadd.f32 %v1383_v23, %v1191_v37  ;;  %v1196_v38 = vpop.f32.mrb[43].mxu0  ;;  %v694_v37 = vpop.permute.xlu1 %693 }
 0x1c0   : > { %v1197_v53 = vadd.f32 %v1196_v38, %v684_v44  ;;  %v1386_v50 = vadd.f32 %v1385_v60, %v1193_v30 }
 0x1c1   : > { %v1393_v31 = vpop.f32.mrb[40].mxu1  ;;  %v1546_v16 = vmul.f32 0.1, %v1384_v61  ;;  %v1388_v27 = vadd.f32 %v1387_v9, %v1195_v51  ;;  %vm1482_vm4 = vcmp.gt.f32.partialorder %v1384_v61, 0.0 }
 0x1c2   : > { %v1395_v48 = vpop.f32.mrb[41].mxu1  ;;  %v1547_v36 = vmul.f32 0.1, %v1386_v50  ;;  %v1390_v45 = vadd.f32 %v1389_v4, %v1197_v53  ;;  %vm1483_vm5 = vcmp.gt.f32.partialorder %v1386_v50, 0.0 }
 0x1c3   : > { %v1397_v10 = vpop.f32.mrb[42].mxu1  ;;  %vm1484_vm6 = vcmp.gt.f32.partialorder %v1388_v27, 0.0  ;;  %v1548_v34 = vmul.f32 0.1, %v1388_v27  ;;  %v3070_v3 = vsel %vm1482_vm4, %v1384_v61, %v1546_v16 }
 0x1c4   : > { %v1399_v11 = vpop.f32.mrb[43].mxu1  ;;  %vm1485_vm7 = vcmp.gt.f32.partialorder %v1390_v45, 0.0  ;;  %v1549_v23 = vmul.f32 0.1, %v1390_v45  ;;  %v1200_v8 = vpop.f32.mrb[44].mxu0  ;;  %3290 = vst [vmem:[#allocation11_spill] sm:$0xff] %v3070_v3  ;;  %v3076_v30 = vsel %vm1483_vm5, %v1386_v50, %v1547_v36 }
 0x1c5   : > { %v3072_v38 = vsel %vm1484_vm6, %v1388_v27, %v1548_v34  ;;  %v1201_v60 = vadd.f32 %v1200_v8, %v689_v5  ;;  %v1202_v51 = vpop.f32.mrb[45].mxu0  ;;  %3292 = vst [vmem:[#allocation13_spill] sm:$0xff] %v3076_v30 }
 0x1c6   : > { %3291 = vst [vmem:[#allocation12_spill] sm:$0xff] %v3072_v38  ;;  %v1203_v4 = vadd.f32 %v1202_v51, %v689_v5  ;;  %v1204_v44 = vpop.f32.mrb[46].mxu0  ;;  %v3078_v53 = vsel %vm1485_vm7, %v1390_v45, %v1549_v23  ;;  %v699_v51 = vpop.permute.xlu0 %698 }
 0x1c7   : > { %3293 = vst [vmem:[#allocation14_spill] sm:$0xff] %v3078_v53  ;;  %v1205_v43 = vadd.f32 %v1204_v44, %v694_v37  ;;  %v1394_v39 = vadd.f32 %v1393_v31, %v1201_v60  ;;  %v1206_v28 = vpop.f32.mrb[47].mxu0  ;;  %v704_v60 = vpop.permute.xlu1 %703 }
 0x1c8   : > { %v1207_v16 = vadd.f32 %v1206_v28, %v694_v37  ;;  %v1396_v27 = vadd.f32 %v1395_v48, %v1203_v4 }
 0x1c9   : > { %v1403_v34 = vpop.f32.mrb[44].mxu1  ;;  %v1550_v8 = vmul.f32 0.1, %v1394_v39  ;;  %v1398_v49 = vadd.f32 %v1397_v10, %v1205_v43  ;;  %vm1486_vm8 = vcmp.gt.f32.partialorder %v1394_v39, 0.0 }
 0x1ca   : > { %v1405_v2 = vpop.f32.mrb[45].mxu1  ;;  %v1551_v9 = vmul.f32 0.1, %v1396_v27  ;;  %v1400_v5 = vadd.f32 %v1399_v11, %v1207_v16  ;;  %vm1487_vm9 = vcmp.gt.f32.partialorder %v1396_v27, 0.0 }
 0x1cb   : > { %v1407_v36 = vpop.f32.mrb[46].mxu1  ;;  %vm1488_vm10 = vcmp.gt.f32.partialorder %v1398_v49, 0.0  ;;  %v1552_v50 = vmul.f32 0.1, %v1398_v49  ;;  %v3082_v44 = vsel %vm1486_vm8, %v1394_v39, %v1550_v8 }
 0x1cc   : > { %v1409_v45 = vpop.f32.mrb[47].mxu1  ;;  %vm1489_vm11 = vcmp.gt.f32.partialorder %v1400_v5, 0.0  ;;  %v1553_v31 = vmul.f32 0.1, %v1400_v5  ;;  %v1210_v23 = vpop.f32.mrb[48].mxu0  ;;  %3294 = vst [vmem:[#allocation15_spill] sm:$0xff] %v3082_v44  ;;  %v3088_v4 = vsel %vm1487_vm9, %v1396_v27, %v1551_v9 }
 0x1cd   : > { %v3084_v48 = vsel %vm1488_vm10, %v1398_v49, %v1552_v50  ;;  %v1211_v28 = vadd.f32 %v1210_v23, %v699_v51  ;;  %v1212_v43 = vpop.f32.mrb[49].mxu0  ;;  %3296 = vst [vmem:[#allocation17_spill] sm:$0xff] %v3088_v4 }
 0x1ce   : > { %3295 = vst [vmem:[#allocation16_spill] sm:$0xff] %v3084_v48  ;;  %v1213_v11 = vadd.f32 %v1212_v43, %v699_v51  ;;  %v1214_v37 = vpop.f32.mrb[50].mxu0  ;;  %v3090_v16 = vsel %vm1489_vm11, %v1400_v5, %v1553_v31  ;;  %v709_v43 = vpop.permute.xlu0 %708 }
 0x1cf   : > { %3297 = vst [vmem:[#allocation18_spill] sm:$0xff] %v3090_v16  ;;  %v1215_v61 = vadd.f32 %v1214_v37, %v704_v60  ;;  %v1404_v3 = vadd.f32 %v1403_v34, %v1211_v28  ;;  %v1216_v38 = vpop.f32.mrb[51].mxu0  ;;  %v714_v28 = vpop.permute.xlu1 %713 }
 0x1d0   : > { %v1217_v8 = vadd.f32 %v1216_v38, %v704_v60  ;;  %v1406_v49 = vadd.f32 %v1405_v2, %v1213_v11 }
 0x1d1   : > { %v1413_v50 = vpop.f32.mrb[48].mxu1  ;;  %v1554_v23 = vmul.f32 0.1, %v1404_v3  ;;  %v1408_v30 = vadd.f32 %v1407_v36, %v1215_v61  ;;  %vm1490_vm12 = vcmp.gt.f32.partialorder %v1404_v3, 0.0 }
 0x1d2   : > { %v1415_v53 = vpop.f32.mrb[49].mxu1  ;;  %v1555_v10 = vmul.f32 0.1, %v1406_v49  ;;  %v1410_v51 = vadd.f32 %v1409_v45, %v1217_v8  ;;  %vm1491_vm13 = vcmp.gt.f32.partialorder %v1406_v49, 0.0 }
 0x1d3   : > { %v1417_v9 = vpop.f32.mrb[50].mxu1  ;;  %vm1492_vm14 = vcmp.gt.f32.partialorder %v1408_v30, 0.0  ;;  %v1556_v27 = vmul.f32 0.1, %v1408_v30  ;;  %v3094_v37 = vsel %vm1490_vm12, %v1404_v3, %v1554_v23 }
 0x1d4   : > { %v1419_v5 = vpop.f32.mrb[51].mxu1  ;;  %vm1493_vm15 = vcmp.gt.f32.partialorder %v1410_v51, 0.0  ;;  %v1557_v34 = vmul.f32 0.1, %v1410_v51  ;;  %v1220_v31 = vpop.f32.mrb[52].mxu0  ;;  %3298 = vst [vmem:[#allocation19_spill] sm:$0xff] %v3094_v37  ;;  %v3100_v11 = vsel %vm1491_vm13, %v1406_v49, %v1555_v10 }
 0x1d5   : > { %v3096_v2 = vsel %vm1492_vm14, %v1408_v30, %v1556_v27  ;;  %v1221_v38 = vadd.f32 %v1220_v31, %v709_v43  ;;  %v1222_v61 = vpop.f32.mrb[53].mxu0  ;;  %3300 = vst [vmem:[#allocation21_spill] sm:$0xff] %v3100_v11 }
 0x1d6   : > { %3299 = vst [vmem:[#allocation20_spill] sm:$0xff] %v3096_v2  ;;  %v1223_v45 = vadd.f32 %v1222_v61, %v709_v43  ;;  %v1224_v60 = vpop.f32.mrb[54].mxu0  ;;  %v3102_v8 = vsel %vm1493_vm15, %v1410_v51, %v1557_v34  ;;  %v719_v61 = vpop.permute.xlu0 %718 }
 0x1d7   : > { %3301 = vst [vmem:[#allocation22_spill] sm:$0xff] %v3102_v8  ;;  %v1225_v39 = vadd.f32 %v1224_v60, %v714_v28  ;;  %v1414_v44 = vadd.f32 %v1413_v50, %v1221_v38  ;;  %v1226_v48 = vpop.f32.mrb[55].mxu0  ;;  %v724_v38 = vpop.permute.xlu1 %723 }
 0x1d8   : > { %v1227_v23 = vadd.f32 %v1226_v48, %v714_v28  ;;  %v1416_v30 = vadd.f32 %v1415_v53, %v1223_v45 }
 0x1d9   : > { %v1423_v27 = vpop.f32.mrb[52].mxu1  ;;  %v1558_v31 = vmul.f32 0.1, %v1414_v44  ;;  %v1418_v4 = vadd.f32 %v1417_v9, %v1225_v39  ;;  %vm1494_vm0 = vcmp.gt.f32.partialorder %v1414_v44, 0.0 }
 0x1da   : > { %v1425_v16 = vpop.f32.mrb[53].mxu1  ;;  %v1559_v36 = vmul.f32 0.1, %v1416_v30  ;;  %v1420_v43 = vadd.f32 %v1419_v5, %v1227_v23  ;;  %vm1495_vm1 = vcmp.gt.f32.partialorder %v1416_v30, 0.0 }
 0x1db   : > { %v1427_v10 = vpop.f32.mrb[54].mxu1  ;;  %vm1496_vm2 = vcmp.gt.f32.partialorder %v1418_v4, 0.0  ;;  %v1560_v49 = vmul.f32 0.1, %v1418_v4  ;;  %v3106_v60 = vsel %vm1494_vm0, %v1414_v44, %v1558_v31 }
 0x1dc   : > { %v1429_v51 = vpop.f32.mrb[55].mxu1  ;;  %vm1497_vm3 = vcmp.gt.f32.partialorder %v1420_v43, 0.0  ;;  %v1561_v50 = vmul.f32 0.1, %v1420_v43  ;;  %v1230_v34 = vpop.f32.mrb[56].mxu0  ;;  %3302 = vst [vmem:[#allocation23_spill] sm:$0xff] %v3106_v60  ;;  %v3112_v45 = vsel %vm1495_vm1, %v1416_v30, %v1559_v36 }
 0x1dd   : > { %v3108_v53 = vsel %vm1496_vm2, %v1418_v4, %v1560_v49  ;;  %v1231_v48 = vadd.f32 %v1230_v34, %v719_v61  ;;  %v1232_v39 = vpop.f32.mrb[57].mxu0  ;;  %3304 = vst [vmem:[#allocation25_spill] sm:$0xff] %v3112_v45 }
 0x1de   : > { %3303 = vst [vmem:[#allocation24_spill] sm:$0xff] %v3108_v53  ;;  %v1233_v5 = vadd.f32 %v1232_v39, %v719_v61  ;;  %v1234_v28 = vpop.f32.mrb[58].mxu0  ;;  %v3114_v23 = vsel %vm1497_vm3, %v1420_v43, %v1561_v50  ;;  %v729_v39 = vpop.permute.xlu0 %728 }
 0x1df   : > { %3305 = vst [vmem:[#allocation26_spill] sm:$0xff] %v3114_v23  ;;  %v1235_v3 = vadd.f32 %v1234_v28, %v724_v38  ;;  %v1424_v37 = vadd.f32 %v1423_v27, %v1231_v48  ;;  %v1236_v2 = vpop.f32.mrb[59].mxu0  ;;  %v734_v48 = vpop.permute.xlu1 %733 }
 0x1e0   : > { %v1237_v31 = vadd.f32 %v1236_v2, %v724_v38  ;;  %v1426_v4 = vadd.f32 %v1425_v16, %v1233_v5 }
 0x1e1   : > { %v1433_v49 = vpop.f32.mrb[56].mxu1  ;;  %v1562_v34 = vmul.f32 0.1, %v1424_v37  ;;  %v1428_v11 = vadd.f32 %v1427_v10, %v1235_v3  ;;  %vm1498_vm4 = vcmp.gt.f32.partialorder %v1424_v37, 0.0 }
 0x1e2   : > { %v1435_v8 = vpop.f32.mrb[57].mxu1  ;;  %v1563_v9 = vmul.f32 0.1, %v1426_v4  ;;  %v1430_v61 = vadd.f32 %v1429_v51, %v1237_v31  ;;  %vm1499_vm5 = vcmp.gt.f32.partialorder %v1426_v4, 0.0 }
 0x1e3   : > { %v1437_v36 = vpop.f32.mrb[58].mxu1  ;;  %vm1500_vm6 = vcmp.gt.f32.partialorder %v1428_v11, 0.0  ;;  %v1564_v30 = vmul.f32 0.1, %v1428_v11  ;;  %v3118_v28 = vsel %vm1498_vm4, %v1424_v37, %v1562_v34 }
 0x1e4   : > { %v1439_v43 = vpop.f32.mrb[59].mxu1  ;;  %vm1501_vm7 = vcmp.gt.f32.partialorder %v1430_v61, 0.0  ;;  %v1565_v27 = vmul.f32 0.1, %v1430_v61  ;;  %v1240_v50 = vpop.f32.mrb[60].mxu0  ;;  %v3124_v5 = vsel %vm1499_vm5, %v1426_v4, %v1563_v9 }
 0x1e5   : > { %v3120_v16 = vsel %vm1500_vm6, %v1428_v11, %v1564_v30  ;;  %v1241_v2 = vadd.f32 %v1240_v50, %v729_v39  ;;  %v1242_v3 = vpop.f32.mrb[61].mxu0 }
 0x1e6   : > { %v1243_v51 = vadd.f32 %v1242_v3, %v729_v39  ;;  %v1244_v38 = vpop.f32.mrb[62].mxu0  ;;  %v3126_v31 = vsel %vm1501_vm7, %v1430_v61, %v1565_v27 }
 0x1e7   : > { %v1245_v44 = vadd.f32 %v1244_v38, %v734_v48  ;;  %v1434_v60 = vadd.f32 %v1433_v49, %v1241_v2  ;;  %v1246_v53 = vpop.f32.mrb[63].mxu0  ;;  %v1667_v37 = vpack.c.bf16 %v3126_v31, %v3124_v5  ;;  %v2297_v5 = vld [vmem:[%s3253_s3 + $0x10] ss:$8 sps:$4 sm:$0x3f]  }
 0x1e8   : > { %v1247_v34 = vadd.f32 %v1246_v53, %v734_v48  ;;  %v1436_v11 = vadd.f32 %v1435_v8, %v1243_v51 }
 0x1e9   : > { %v1566_v30 = vmul.f32 0.1, %v1434_v60  ;;  %v1438_v50 = vadd.f32 %v1437_v36, %v1245_v44  ;;  %vm1502_vm8 = vcmp.gt.f32.partialorder %v1434_v60, 0.0 }
 0x1ea   : > { %v1567_v45 = vmul.f32 0.1, %v1436_v11  ;;  %v1440_v23 = vadd.f32 %v1439_v43, %v1247_v34  ;;  %vm1503_vm9 = vcmp.gt.f32.partialorder %v1436_v11, 0.0 }
 0x1eb   : > { %vm1504_vm10 = vcmp.gt.f32.partialorder %v1438_v50, 0.0  ;;  %v1568_v39 = vmul.f32 0.1, %v1438_v50  ;;  %v1630_v61 = vsel %vm1502_vm8, %v1434_v60, %v1566_v30 }
 0x1ec   : > { %vm1505_vm11 = vcmp.gt.f32.partialorder %v1440_v23, 0.0  ;;  %v1569_v9 = vmul.f32 0.1, %v1440_v23  ;;  %v1283_v4 = vpop.f32.mrb[0].mxu0  ;;  %v1631_v48 = vsel %vm1503_vm9, %v1436_v11, %v1567_v45  ;;  %v3306_v11 = vpack.c.bf16 %v2966_v32, %v2964_v22 }
 0x1ed   : > { %v1632_v27 = vsel %vm1504_vm10, %v1438_v50, %v1568_v39  ;;  %v1997_v49 = vadd.f32 %v1283_v4, %v2954_v17  ;;  %v1285_v2 = vpop.f32.mrb[1].mxu0  ;;  %v3311_v22 = vpack.c.bf16 %v2984_v26, %v2982_v46  ;;  %v3314_v32 = vpack.c.bf16 %v3014_v62, %v3012_v59  ;;  %v3330_v62 = vld [vmem:[#allocation12_spill] sm:$0xff] }
 0x1ee   : > { %v1668_v3 = vpack.c.bf16 %v1632_v27, %v1630_v61  ;;  %v1998_v53 = vadd.f32 %v1285_v2, %v2954_v17  ;;  %v1287_v8 = vpop.f32.mrb[2].mxu0  ;;  %v1633_v44 = vsel %vm1505_vm11, %v1440_v23, %v1569_v9  ;;  %v3308_v9 = vpack.c.bf16 %v2978_v18, %v2976_v54  ;;  %v3346_v2 = vld [vmem:[#allocation25_spill] sm:$0xff] }
 0x1ef   : > { %v1506_v36 = vmul.f32 0.1, %v1997_v49  ;;  %v1999_v43 = vadd.f32 %v1287_v8, %v2956_v25  ;;  %v1289_v51 = vpop.f32.mrb[3].mxu0  ;;  %v1669_v38 = vpack.c.bf16 %v1633_v44, %v1631_v48  ;;  %vm1442_vm12 = vcmp.gt.f32.partialorder %v1997_v49, 0.0  ;;  %v3348_v8 = vld [vmem:[#allocation24_spill] sm:$0xff]  ;;  %v3349_v48 = vld [vmem:[#allocation23_spill] sm:$0xff] }
 0x1f0   : > { %v1507_v34 = vmul.f32 0.1, %v1998_v53  ;;  %v2000_v10 = vadd.f32 %v1289_v51, %v2956_v25  ;;  %vm1443_vm13 = vcmp.gt.f32.partialorder %v1998_v53, 0.0  ;;  %v3307_v25 = vpack.c.bf16 %v2960_v52, %v2958_v42  ;;  %v2295_v51 = vld [vmem:[%s3253_s3 + $0x14] ss:$8 sps:$4 sm:$0x3f]  }
 0x1f1   : > { %vm1444_vm14 = vcmp.gt.f32.partialorder %v1999_v43, 0.0  ;;  %v1508_v60 = vmul.f32 0.1, %v1999_v43  ;;  %v1570_v50 = vsel %vm1442_vm12, %v1997_v49, %v1506_v36  ;;  %v3309_v61 = vpack.c.bf16 %v2972_v12, %v2970_v24  ;;  %v3345_v49 = vld [vmem:[#allocation26_spill] sm:$0xff] }
 0x1f2   : > { %vm1445_vm15 = vcmp.gt.f32.partialorder %v2000_v10, 0.0  ;;  %v1509_v30 = vmul.f32 0.1, %v2000_v10  ;;  %v1571_v4 = vsel %vm1443_vm13, %v1998_v53, %v1507_v34  ;;  %v3312_v42 = vpack.c.bf16 %v3002_v21, %v3000_v15  ;;  %v3325_v15 = vld [vmem:[#allocation8_spill] sm:$0xff] }
 0x1f3   : > { %v1572_v39 = vsel %vm1444_vm14, %v1999_v43, %v1508_v60  ;;  %v3313_v52 = vpack.c.bf16 %v2996_v35, %v2994_v14  ;;  %v3315_v24 = vpack.c.bf16 %v3008_v63, %v3006_v33  ;;  %v3316_v12 = vpack.c.bf16 %v3026_v57, %v3024_v55  ;;  %v3324_v35 = vld [vmem:[#allocation9_spill] sm:$0xff]  ;;  %v3327_v33 = vld [vmem:[#allocation14_spill] sm:$0xff] }
 0x1f4   : > { %v1638_v17 = vpack.c.bf16 %v1572_v39, %v1570_v50  ;;  %v1573_v45 = vsel %vm1445_vm15, %v2000_v10, %v1509_v30  ;;  %v3310_v10 = vpack.c.bf16 %v2990_v20, %v2988_v56  ;;  %v3317_v54 = vpack.c.bf16 %v3020_v41, %v3018_v6  ;;  %v3322_v20 = vld [vmem:[#allocation10_spill] sm:$0xff]  ;;  %v3328_v63 = vld [vmem:[#allocation13_spill] sm:$0xff]  ;;  %v3331_v6 = vld [vmem:[#allocation11_spill] sm:$0xff] }
 0x1f5   : > { %v1639_v23 = vpack.c.bf16 %v1573_v45, %v1571_v4  ;;  %v3318_v18 = vpack.c.bf16 %v3038_v58, %v3036_v40  ;;  %v3319_v46 = vpack.c.bf16 %v3032_v1, %v3030_v13  ;;  %v3320_v26 = vpack.c.bf16 %v3054_v0, %v3052_v7  ;;  %v3333_v55 = vld [vmem:[#allocation18_spill] sm:$0xff]  ;;  %v3334_v57 = vld [vmem:[#allocation17_spill] sm:$0xff]  ;;  %v3336_v1 = vld [vmem:[#allocation16_spill] sm:$0xff] }
 0x1f6   : > { %v3321_v56 = vpack.c.bf16 %v3044_v29, %v3042_v47  ;;  %v3323_v14 = vpack.c.bf16 %v3066_v19, %v3322_v20  ;;  %v3326_v21 = vpack.c.bf16 %v3324_v35, %v3325_v15  ;;  %v3329_v59 = vpack.c.bf16 %v3327_v33, %v3328_v63  ;;  %v3337_v40 = vld [vmem:[#allocation15_spill] sm:$0xff]  ;;  %v3339_v0 = vld [vmem:[#allocation22_spill] sm:$0xff]  ;;  %v3340_v47 = vld [vmem:[#allocation21_spill] sm:$0xff] }
 0x1f7   : > { %1714 = vmatprep.subr.bf16.mxu1 %v1639_v23  ;;  %v3332_v41 = vpack.c.bf16 %v3330_v62, %v3331_v6  ;;  %v3335_v13 = vpack.c.bf16 %v3333_v55, %v3334_v57  ;;  %v3338_v58 = vpack.c.bf16 %v3336_v1, %v3337_v40  ;;  %v3341_v29 = vpack.c.bf16 %v3339_v0, %v3340_v47  ;;  %v3342_v7 = vld [vmem:[#allocation20_spill] sm:$0xff]  ;;  %v3343_v19 = vld [vmem:[#allocation19_spill] sm:$0xff] }
 0x1f8   : > { %1715 = vmatpush1.bf16.msra.mxu1 %v1638_v17  ;;  %v3344_v27 = vpack.c.bf16 %v3342_v7, %v3343_v19  ;;  %v3347_v53 = vpack.c.bf16 %v3345_v49, %v3346_v2  ;;  %v3350_v44 = vpack.c.bf16 %v3348_v8, %v3349_v48  ;;  %v3351_v36 = vpack.c.bf16 %v3120_v16, %v3118_v28  ;;  %v2292_v43 = vld [vmem:[%s3253_s3] ss:$8 sps:$4 sm:$0xff]   ;;  %v1677_v28 = vpop.permute.xlu0 %1676 }
 0x1f9   : > { %1716 = vmatprep.subr.bf16.mxu1 %v3306_v11 }
 0x1fc   : > { %1717 = vmatpush1.bf16.msra.mxu1 %v3307_v25  ;;  %v1687_v39 = vpop.permute.xlu0 %1686 }
 0x1fd   : > { %1718 = vmatprep.subr.bf16.mxu1 %v3308_v9 }
 0x200   : > { %1719 = vmatpush1.bf16.msra.mxu1 %v3309_v61 }
 0x201   : > { %1720 = vmatprep.subr.bf16.mxu1 %v3310_v10 }
 0x204   : > { %1721 = vmatpush1.bf16.msra.mxu1 %v3311_v22 }
 0x205   : > { %1722 = vmatprep.subr.bf16.mxu1 %v3312_v42 }
 0x208   : > { %1723 = vmatpush1.bf16.msra.mxu1 %v3313_v52 }
 0x209   : > { %1724 = vmatprep.subr.bf16.mxu1 %v3314_v32 }
 0x20c   : > { %1725 = vmatpush1.bf16.msra.mxu1 %v3315_v24 }
 0x20d   : > { %1726 = vmatprep.subr.bf16.mxu1 %v3316_v12 }
 0x210   : > { %1727 = vmatpush1.bf16.msra.mxu1 %v3317_v54 }
 0x211   : > { %1728 = vmatprep.subr.bf16.mxu1 %v3318_v18 }
 0x214   : > { %1729 = vmatpush1.bf16.msra.mxu1 %v3319_v46 }
 0x215   : > { %1730 = vmatprep.subr.bf16.mxu1 %v3320_v26 }
 0x218   : > { %1731 = vmatpush1.bf16.msra.mxu1 %v3321_v56 }
 0x219   : > { %1732 = vmatprep.subr.bf16.mxu1 %v3323_v14 }
 0x21c   : > { %1733 = vmatpush1.bf16.msra.mxu1 %v3326_v21 }
 0x21d   : > { %1734 = vmatprep.subr.bf16.mxu1 %v3329_v59 }
 0x220   : > { %1735 = vmatpush1.bf16.msra.mxu1 %v3332_v41 }
 0x221   : > { %1736 = vmatprep.subr.bf16.mxu1 %v3335_v13 }
 0x224   : > { %1737 = vmatpush1.bf16.msra.mxu1 %v3338_v58 }
 0x225   : > { %1738 = vmatprep.subr.bf16.mxu1 %v3341_v29 }
 0x228   : > { %1739 = vmatpush1.bf16.msra.mxu1 %v3344_v27 }
 0x229   : > { %1740 = vmatprep.subr.bf16.mxu1 %v3347_v53 }
 0x22c   : > { %1741 = vmatpush1.bf16.msra.mxu1 %v3350_v44 }
 0x22d   : > { %1742 = vmatprep.subr.bf16.mxu1 %v1667_v37 }
 0x230   : > { %1743 = vmatpush1.bf16.msra.mxu1 %v3351_v36 }
 0x231   : > { %1744 = vmatprep.subr.bf16.mxu1 %v1669_v38 }
 0x234   : > { %1745 = vmatpush1.bf16.msra.mxu1 %v1668_v3  ;;  %v1682_v3 = vpop.permute.xlu1 %1681 }
 0x237   : > { %1747 = vmatmul.mubr.bf16.vlgmr.msra.gmra.mrb[60].mxu1 %v2292_v43 }
 0x238   : > { %1756 = vmatprep.mubr.bf16.mxu1 %v2295_v51  ;;  %v1692_v23 = vpop.permute.xlu1 %1691 }
 0x23f   : > { %1757 = vmatmul.mubr.bf16.gmra.mrb[64].mxu1 %v2297_v5 }
 0x30a   : > { %v1748_v16 = vpop.f32.mrb[60].mxu1 }
 0x30b   : > { %v1749_v31 = vadd.f32 %v1748_v16, %v1677_v28  ;;  %v1750_v37 = vpop.f32.mrb[61].mxu1 }
 0x30c   : > { %v1751_v38 = vadd.f32 %v1750_v37, %v1677_v28  ;;  %v1752_v34 = vpop.f32.mrb[62].mxu1 }
 0x30d   : > { %1767 = vst [vmem:[%s286_s11] sm:$0xff] %v1749_v31  ;;  %v1753_v60 = vadd.f32 %v1752_v34, %v1682_v3  ;;  %v1754_v30 = vpop.f32.mrb[63].mxu1 }
 0x30e   : > { %1768 = vst [vmem:[%s286_s11 + $0x8] sm:$0xff] %v1751_v38  ;;  %v1755_v50 = vadd.f32 %v1754_v30, %v1682_v3 }
 0x30f   : > { %1769 = vst [vmem:[%s286_s11 + $0x10] sm:$0xff] %v1753_v60 }
 0x310   : > { %1770 = vst [vmem:[%s286_s11 + $0x18] sm:$0xff] %v1755_v50 }
 0x312   : > { %v1758_v17 = vpop.f32.mrb[64].mxu1 }
 0x313   : > { %v1759_v4 = vadd.f32 %v1758_v17, %v1687_v39  ;;  %v1760_v45 = vpop.f32.mrb[65].mxu1 }
 0x314   : > { %v1761_v11 = vadd.f32 %v1760_v45, %v1687_v39  ;;  %v1762_v25 = vpop.f32.mrb[66].mxu1 }
 0x315   : > { %1771 = vst [vmem:[%s286_s11 + $0x20] sm:$0xff] %v1759_v4  ;;  %v1763_v9 = vadd.f32 %v1762_v25, %v1692_v23  ;;  %v1764_v61 = vpop.f32.mrb[67].mxu1 }
 0x316   : > { %1772 = vst [vmem:[%s286_s11 + $0x28] sm:$0xff] %v1761_v11  ;;  %v1765_v10 = vadd.f32 %v1764_v61, %v1692_v23 }
 0x317   : > { %1773 = vst [vmem:[%s286_s11 + $0x30] sm:$0x7] %v1763_v9 }
 0x318   : > { %1774 = vst [vmem:[%s286_s11 + $0x38] sm:$0x7] %v1765_v10 }
 0x319 PF: > { %s19_s23 = sadd.s32 1, %s2410_s23   ;;  %s3352_s18 = smov %s2394_s19 }
 0x31a   : > { %p16_p1 = scmp.ge.s32.totalorder %s19_s23, 4   ;;  %s3353_s19 = smov %s2398_s20 }
 0x31b   : > { %s3354_s20 = smov %s2533_s9  ;;  %s3355_s21 = smov %s2406_s22 }
 0x31c   : > { %s3356_s22 = smov %s3358_s6  ;;  %18 = sbr.rel (!%p16_p1) target bundleno = 5 (0x5), region = 84 }
 0x323   :  { %1805 = vsyncpa [#allocation3], 1 }
 0x324   :  { %1807 = vsyncpa [#allocation3 + $0x1], 1 }
 0x325   :  { %1808 = vsyncpa [#allocation5], 1 }

</bundles_post_ra>
